<compile_context>
chip_gen: v7x
topology: tpu7x:2x2x1
jax: 0.10.0
libtpu: 0.0.40
codegen_flags: <defaults>
</compile_context>

<pallas_src>
import functools

import jax
import jax.numpy as jnp
from jax import lax
from jax.experimental import pallas as pl
from jax.experimental.pallas import tpu as pltpu


def _rup(x: int, m: int) -> int:
    return ((x + m - 1) // m) * m


# ----------------------------- Pallas kernel -------------------------------

def _eda_kernel(x_ref, ewih_ref, ewhh_ref, eb_ref, dwhh_ref, db_ref,
                att_ref, h_scr, c_scr, xp_scr, *, seq_len):
    """Fused encoder(LSTM over T, keep only h/c) + decoder(LSTM over S, zero input).

    Grid = (batch_blocks ["parallel"], time_chunks ["arbitrary"]).

    x_ref    : (tT, bB, D) bf16  time-major chunk of the encoder input
    ewih_ref : (D, 4D)     bf16  encoder input->gate weights, gate order [i|f|g|o]
    ewhh_ref : (D, 4D)     bf16  encoder hidden->gate weights
    eb_ref   : (1, 4D)     f32   encoder combined bias (b_ih + b_hh)
    dwhh_ref : (D, 4D)     bf16  decoder hidden->gate weights
    db_ref   : (1, 4D)     f32   decoder combined bias (b_ih + b_hh)
    att_ref  : (S, bB, D)  f32   attractors (speaker-major; wrapper transposes)
    h_scr/c_scr : (bB, D)  f32   recurrent state, persists across time chunks
    xp_scr   : (tT, bB, 4D) f32  staged hoisted input projection
    seq_len  : static true T; padded tail timesteps are masked out.
    """
    tT, bB, D = x_ref.shape
    S = att_ref.shape[0]
    G = 4 * D
    t_idx = pl.program_id(1)
    needs_mask = (seq_len % tT) != 0          # static: only true when T was padded

    @pl.when(t_idx == 0)
    def _init():
        h_scr[...] = jnp.zeros_like(h_scr)
        c_scr[...] = jnp.zeros_like(c_scr)

    # ---- encoder: hoisted input projection for the whole chunk (one wide MXU matmul,
    #      bf16 operands / f32 accumulate), staged into VMEM scratch ----
    x2d = x_ref[...].reshape(tT * bB, D)
    xp = jnp.dot(x2d, ewih_ref[...], preferred_element_type=jnp.float32) + eb_ref[...]
    xp_scr[...] = xp.reshape(tT, bB, G)

    ewhh = ewhh_ref[...]
    base_t = t_idx * tT

    def lstm_cell(pre, h, c):
        # NOTE: gate slices are exact lane blocks when D % 128 == 0 (production D=256);
        # smaller D still works but pays sub-vreg lane selects.
        i_g = jax.nn.sigmoid(pre[:, 0:D])
        f_g = jax.nn.sigmoid(pre[:, D:2 * D])
        g_g = jnp.tanh(pre[:, 2 * D:3 * D])
        o_g = jax.nn.sigmoid(pre[:, 3 * D:4 * D])
        c_n = f_g * c + i_g * g_g
        h_n = o_g * jnp.tanh(c_n)
        return h_n, c_n

    def enc_step(t, h, c):
        pre = xp_scr[t] + jnp.dot(h.astype(jnp.bfloat16), ewhh,
                                  preferred_element_type=jnp.float32)
        h_n, c_n = lstm_cell(pre, h, c)
        if needs_mask:                         # static branch; masks padded tail steps
            valid = (base_t + t) < seq_len
            h_n = jnp.where(valid, h_n, h)
            c_n = jnp.where(valid, c_n, c)
        return h_n, c_n

    h = h_scr[...]
    c = c_scr[...]
    if tT <= 64:
        for t in range(tT):                    # full static unroll (LLO-visible)
            h, c = enc_step(t, h, c)
    else:                                      # bound code size / live ranges for big chunks
        h, c = lax.fori_loop(0, tT, lambda t, hc: enc_step(t, *hc), (h, c), unroll=8)
    h_scr[...] = h
    c_scr[...] = c

    # ---- decoder: only on the final time chunk; zero input => just h @ W_hh + bias ----
    @pl.when(t_idx == pl.num_programs(1) - 1)
    def _decode():
        dwhh = dwhh_ref[...]
        db = db_ref[...]
        h_d, c_d = h, c
        for s in range(S):                     # S = max_n_speakers + 1 (small)
            pre = jnp.dot(h_d.astype(jnp.bfloat16), dwhh,
                          preferred_element_type=jnp.float32) + db
            h_d, c_d = lstm_cell(pre, h_d, c_d)
            att_ref[s] = h_d                   # full (bB, D) slab store (lane-dense)


# ---------------------------- VMEM budgeting --------------------------------

def _vmem_budget_bytes(tT, bB, D, S):
    """Conservative scoped-VMEM budget (tile-padded, everything counted double-buffered)."""
    G = 4 * D

    def padded(shape, itemsize):
        d = list(shape)
        d[-1] = _rup(d[-1], 128)
        if len(d) >= 2:
            d[-2] = _rup(d[-2], 8)
        n = 1
        for v in d:
            n *= v
        return n * itemsize

    est = (2 * padded((tT, bB, D), 2)              # streamed x chunk (bf16)
           + 2 * 3 * padded((D, G), 2)             # 3 weight matrices (bf16)
           + 2 * 2 * padded((1, G), 4)             # 2 biases
           + 2 * padded((S, bB, D), 4)             # output block
           + 2 * padded((bB, D), 4)                # h, c scratch
           + padded((tT, bB, G), 4))               # staged input projection
    # 2x headroom, clamped to [32 MiB, 64 MiB] so the request is valid on v5e/v6e/v7x.
    return int(max(32 << 20, min(64 << 20, 2 * est)))


# ------------------------ EncoderDecoderAttractor --------------------------

def eda_forward(params, xs, zeros, *, time_chunk: int = 128, batch_block: int | None = None):
    """Equivalent of EncoderDecoderAttractor.forward(xs, zeros) -> attractors (B, S, D).

    The decoder input is assumed to be all-zeros (exactly how the module is used in
    estimate()/__call__); only zeros.shape[1] (= S) is consulted.
    """
    B, T, D = xs.shape
    S = zeros.shape[1]
    G = 4 * D

    # Time chunk: multiple of 8; T is padded up to a multiple of tT and the tail is masked.
    tT = max(8, (min(time_chunk, _rup(T, 8)) // 8) * 8)
    T_pad = _rup(T, tT)

    # Batch block: default = whole padded batch (maximizes per-step matmul M / MXU fill).
    # Pass batch_block to split the batch over the "parallel" grid axis (e.g. half per TC on v7x).
    bB = B if batch_block is None else min(batch_block, B)
    bB = _rup(max(bB, 1), 8)
    B_pad = _rup(B, bB)

    # Time-major, bf16, padded input stream.
    x = jnp.transpose(xs.astype(jnp.bfloat16), (1, 0, 2))
    if (T_pad, B_pad) != (T, B):
        x = jnp.pad(x, ((0, T_pad - T), (0, B_pad - B), (0, 0)))

    enc_wih = params["enc_wih"].astype(jnp.bfloat16)
    enc_whh = params["enc_whh"].astype(jnp.bfloat16)
    dec_whh = params["dec_whh"].astype(jnp.bfloat16)
    enc_b = params["enc_b"].astype(jnp.float32)
    dec_b = params["dec_b"].astype(jnp.float32)

    grid = (B_pad // bB, T_pad // tT)
    kernel = functools.partial(_eda_kernel, seq_len=T)

    def wspec(shape):  # grid-invariant operand: single-buffered
        return pl.BlockSpec(shape, lambda b, t: (0, 0), pipeline_mode=pl.Buffered(1))

    att = pl.pallas_call(
        kernel,
        out_shape=jax.ShapeDtypeStruct((S, B_pad, D), jnp.float32),
        grid_spec=pltpu.PrefetchScalarGridSpec(
            num_scalar_prefetch=0,
            grid=grid,
            in_specs=[
                pl.BlockSpec((tT, bB, D), lambda b, t: (t, b, 0)),   # streamed x chunks
                wspec((D, G)),      # enc W_ih
                wspec((D, G)),      # enc W_hh
                wspec((1, G)),      # enc bias
                wspec((D, G)),      # dec W_hh
                wspec((1, G)),      # dec bias
            ],
            out_specs=pl.BlockSpec((S, bB, D), lambda b, t: (0, b, 0)),
            scratch_shapes=[
                pltpu.VMEM((bB, D), jnp.float32),        # h
                pltpu.VMEM((bB, D), jnp.float32),        # c
                pltpu.VMEM((tT, bB, G), jnp.float32),    # staged input projection
            ],
        ),
        compiler_params=pltpu.CompilerParams(
            dimension_semantics=("parallel", "arbitrary"),
            vmem_limit_bytes=_vmem_budget_bytes(tT, bB, D, S),
        ),
    )(x, enc_wih, enc_whh, enc_b, dec_whh, dec_b)

    # (S, B_pad, D) -> (B, S, D)
    return jnp.transpose(att, (1, 0, 2))[:B]


def init_eda_params(key, n_units):
    """Deterministic synthetic parameters (PyTorch LSTM-style uniform init), gate-fused.
    Weights stored bf16 (MXU operands), biases f32."""
    bound = 1.0 / (n_units ** 0.5)
    ks = jax.random.split(key, 10)
    G = 4 * n_units

    def u(k, shape):
        return jax.random.uniform(k, shape, jnp.float32, -bound, bound)

    return dict(
        enc_wih=u(ks[0], (n_units, G)).astype(jnp.bfloat16),
        enc_whh=u(ks[1], (n_units, G)).astype(jnp.bfloat16),
        enc_b=u(ks[2], (1, G)) + u(ks[3], (1, G)),          # b_ih + b_hh
        dec_wih=u(ks[4], (n_units, G)).astype(jnp.bfloat16),  # reference-only (decoder input is 0)
        dec_whh=u(ks[5], (n_units, G)).astype(jnp.bfloat16),
        dec_b=u(ks[6], (1, G)) + u(ks[7], (1, G)),          # b_ih + b_hh
        counter_w=u(ks[8], (n_units, 1)),                   # estimate()/__call__ only
        counter_b=u(ks[9], (1,)),
    )


# -------------------------- pure-JAX reference -----------------------------
# Precision-matched reference: bf16 matmul operands, f32 accumulation / state,
# mirroring the kernel's numerics (the drift vs a pure-f32 LSTM is the documented bf16 cost).

def _lstm_ref(x_btd, wih, whh, b, h0, c0):
    D = h0.shape[-1]
    wih = wih.astype(jnp.bfloat16)
    whh = whh.astype(jnp.bfloat16)
    b = b.astype(jnp.float32)

    def cell(carry, x_t):
        h, c = carry
        pre = (jnp.dot(x_t.astype(jnp.bfloat16), wih, preferred_element_type=jnp.float32)
               + jnp.dot(h.astype(jnp.bfloat16), whh, preferred_element_type=jnp.float32)
               + b)
        i_g = jax.nn.sigmoid(pre[:, :D])
        f_g = jax.nn.sigmoid(pre[:, D:2 * D])
        g_g = jnp.tanh(pre[:, 2 * D:3 * D])
        o_g = jax.nn.sigmoid(pre[:, 3 * D:])
        c = f_g * c + i_g * g_g
        h = o_g * jnp.tanh(c)
        return (h, c), h

    (hT, cT), ys = lax.scan(cell, (h0, c0), jnp.transpose(x_btd, (1, 0, 2)))
    return jnp.transpose(ys, (1, 0, 2)), hT, cT


def eda_forward_ref(params, xs, zeros):
    B, _, D = xs.shape
    h0 = jnp.zeros((B, D), jnp.float32)
    c0 = jnp.zeros((B, D), jnp.float32)
    _, hT, cT = _lstm_ref(xs, params["enc_wih"], params["enc_whh"], params["enc_b"], h0, c0)
    att, _, _ = _lstm_ref(zeros, params["dec_wih"], params["dec_whh"], params["dec_b"], hT, cT)
    return att


# --------------------------------- main -------------------------------------

if __name__ == "__main__":
    B, T, D = 2, 14, 32          # batch, seq length (non multiple of 8 -> exercises pad+mask), n_units
    S = 5                        # max_n_speakers + 1 (decoder sequence length)

    key = jax.random.PRNGKey(0)
    k_param, k_x = jax.random.split(key)
    params = init_eda_params(k_param, D)

    xs = jax.random.normal(k_x, (B, T, D), jnp.float32)    # batched (T, D) embeddings
    zeros = jnp.zeros((B, S, D), jnp.float32)              # decoder zero inputs

    # 1) chunked path: tT=8 -> grid (1, 2); time tail padded+masked; batch padded 2 -> 8.
    ref = eda_forward_ref(params, xs, zeros)
    att = jax.block_until_ready(eda_forward(params, xs, zeros, time_chunk=8))
    assert att.shape == (B, S, D)
    assert jnp.all(jnp.isfinite(att))
    assert jnp.allclose(att, ref, rtol=1e-2, atol=1e-2), (
        f"max abs diff {jnp.max(jnp.abs(att - ref))}")

    # 2) big-chunk path (tT > 64 -> partially unrolled fori_loop recurrence).
    T2 = 72
    xs2 = jax.random.normal(jax.random.PRNGKey(1), (B, T2, D), jnp.float32)
    ref2 = eda_forward_ref(params, xs2, zeros)
    att2 = jax.block_until_ready(eda_forward(params, xs2, zeros, time_chunk=72))
    assert jnp.all(jnp.isfinite(att2))
    assert jnp.allclose(att2, ref2, rtol=1e-2, atol=1e-2), (
        f"max abs diff {jnp.max(jnp.abs(att2 - ref2))}")

    print("KERNEL_OK")
</pallas_src>

<mosaic_0001>
module attributes {stable_mosaic.version = 11 : i64} {
  func.func @_eda_kernel(%arg0: i32, %arg1: i32, %arg2: memref<8x8x32xbf16, #tpu.memory_space<vmem>>, %arg3: memref<32x128xbf16, #tpu.memory_space<vmem>>, %arg4: memref<32x128xbf16, #tpu.memory_space<vmem>>, %arg5: memref<1x128xf32, #tpu.memory_space<vmem>>, %arg6: memref<32x128xbf16, #tpu.memory_space<vmem>>, %arg7: memref<1x128xf32, #tpu.memory_space<vmem>>, %arg8: memref<5x8x32xf32, #tpu.memory_space<vmem>>, %arg9: memref<8x32xf32, #tpu.memory_space<vmem>>, %arg10: memref<8x32xf32, #tpu.memory_space<vmem>>, %arg11: memref<8x8x128xf32, #tpu.memory_space<vmem>>) attributes {dimension_semantics = [#tpu.dimension_semantics<parallel>, #tpu.dimension_semantics<arbitrary>], iteration_bounds = array<i64: 1, 2>, scalar_prefetch = 0 : i64, scratch_operands = 3 : i64, tpu.core_type = #tpu.core_type<tc>, window_params = [{transform_indices = @transform_0, window_bounds = array<i64: 8, 8, 32>}, {pipeline_mode = #tpu.pipeline_mode<synchronous>, transform_indices = @transform_1, window_bounds = array<i64: 32, 128>}, {pipeline_mode = #tpu.pipeline_mode<synchronous>, transform_indices = @transform_2, window_bounds = array<i64: 32, 128>}, {pipeline_mode = #tpu.pipeline_mode<synchronous>, transform_indices = @transform_3, window_bounds = array<i64: 1, 128>}, {pipeline_mode = #tpu.pipeline_mode<synchronous>, transform_indices = @transform_4, window_bounds = array<i64: 32, 128>}, {pipeline_mode = #tpu.pipeline_mode<synchronous>, transform_indices = @transform_5, window_bounds = array<i64: 1, 128>}, {transform_indices = @transform_6, window_bounds = array<i64: 5, 8, 32>}]} {
    %c0_i32 = arith.constant 0 : i32
    %0 = arith.cmpi eq, %arg1, %c0_i32 : i32
    %1 = arith.extui %0 : i1 to i32
    %c0_i32_0 = arith.constant 0 : i32
    %2 = arith.cmpi ne, %1, %c0_i32_0 : i32
    scf.if %2 {
      %cst_79 = arith.constant 0.000000e+00 : f32
      %293 = vector.broadcast %cst_79 : f32 to vector<8x32xf32>
      %c0_80 = arith.constant 0 : index
      %c0_81 = arith.constant 0 : index
      %294 = vector.load %arg9[%c0_80, %c0_81] : memref<8x32xf32, #tpu.memory_space<vmem>>, vector<8x32xf32>
      tpu.vector_store %arg9[%c0_80, %c0_81], %293 {strides = array<i32>} : memref<8x32xf32, #tpu.memory_space<vmem>>, vector<8x32xf32>,
      %cst_82 = arith.constant 0.000000e+00 : f32
      %295 = vector.broadcast %cst_82 : f32 to vector<8x32xf32>
      %c0_83 = arith.constant 0 : index
      %c0_84 = arith.constant 0 : index
      %296 = vector.load %arg10[%c0_83, %c0_84] : memref<8x32xf32, #tpu.memory_space<vmem>>, vector<8x32xf32>
      tpu.vector_store %arg10[%c0_83, %c0_84], %295 {strides = array<i32>} : memref<8x32xf32, #tpu.memory_space<vmem>>, vector<8x32xf32>,
    } else {
    }
    %c0 = arith.constant 0 : index
    %c0_1 = arith.constant 0 : index
    %c0_2 = arith.constant 0 : index
    %3 = vector.load %arg2[%c0, %c0_1, %c0_2] : memref<8x8x32xbf16, #tpu.memory_space<vmem>>, vector<8x8x32xbf16>
    %4 = vector.shape_cast %3 : vector<8x8x32xbf16> to vector<64x32xbf16>
    %c0_3 = arith.constant 0 : index
    %c0_4 = arith.constant 0 : index
    %5 = vector.load %arg3[%c0_3, %c0_4] : memref<32x128xbf16, #tpu.memory_space<vmem>>, vector<32x128xbf16>
    %cst = arith.constant dense<0.000000e+00> : vector<64x128xf32>
    %6 = tpu.matmul %4, %5, %cst {dimension_numbers = #tpu.dot_dimension_numbers<[1], [0], [0], [1], [0, 0, 1, 1], [], []>} : vector<64x32xbf16>, vector<32x128xbf16>, vector<64x128xf32> -> vector<64x128xf32>
    %c0_5 = arith.constant 0 : index
    %c0_6 = arith.constant 0 : index
    %7 = vector.load %arg5[%c0_5, %c0_6] : memref<1x128xf32, #tpu.memory_space<vmem>>, vector<1x128xf32>
    %8 = vector.broadcast %7 : vector<1x128xf32> to vector<64x128xf32>
    %9 = arith.addf %6, %8 : vector<64x128xf32>
    %10 = vector.shape_cast %9 : vector<64x128xf32> to vector<8x8x128xf32>
    %c0_7 = arith.constant 0 : index
    %c0_8 = arith.constant 0 : index
    %c0_9 = arith.constant 0 : index
    %11 = vector.load %arg11[%c0_7, %c0_8, %c0_9] : memref<8x8x128xf32, #tpu.memory_space<vmem>>, vector<8x8x128xf32>
    tpu.vector_store %arg11[%c0_7, %c0_8, %c0_9], %10 {strides = array<i32>} : memref<8x8x128xf32, #tpu.memory_space<vmem>>, vector<8x8x128xf32>,
    %c0_10 = arith.constant 0 : index
    %c0_11 = arith.constant 0 : index
    %12 = vector.load %arg4[%c0_10, %c0_11] : memref<32x128xbf16, #tpu.memory_space<vmem>>, vector<32x128xbf16>
    %c8_i32 = arith.constant 8 : i32
    %13 = arith.muli %arg1, %c8_i32 : i32
    %c0_12 = arith.constant 0 : index
    %c0_13 = arith.constant 0 : index
    %14 = vector.load %arg9[%c0_12, %c0_13] : memref<8x32xf32, #tpu.memory_space<vmem>>, vector<8x32xf32>
    %c0_14 = arith.constant 0 : index
    %c0_15 = arith.constant 0 : index
    %15 = vector.load %arg10[%c0_14, %c0_15] : memref<8x32xf32, #tpu.memory_space<vmem>>, vector<8x32xf32>
    %c0_16 = arith.constant 0 : index
    %c0_17 = arith.constant 0 : index
    %c0_18 = arith.constant 0 : index
    %16 = vector.load %arg11[%c0_16, %c0_17, %c0_18] : memref<8x8x128xf32, #tpu.memory_space<vmem>>, vector<1x8x128xf32>
    %17 = vector.shape_cast %16 : vector<1x8x128xf32> to vector<8x128xf32>
    %18 = arith.truncf %14 : vector<8x32xf32> to vector<8x32xbf16>
    %cst_19 = arith.constant dense<0.000000e+00> : vector<8x128xf32>
    %19 = tpu.matmul %18, %12, %cst_19 {dimension_numbers = #tpu.dot_dimension_numbers<[1], [0], [0], [1], [0, 0, 1, 1], [], []>} : vector<8x32xbf16>, vector<32x128xbf16>, vector<8x128xf32> -> vector<8x128xf32>
    %20 = arith.addf %17, %19 : vector<8x128xf32>
    %21 = vector.extract_strided_slice %20 {offsets = [0, 0], sizes = [8, 32], strides = [1, 1]} : vector<8x128xf32> to vector<8x32xf32>
    %22 = arith.negf %21 : vector<8x32xf32>
    %23 = math.exp %22 : vector<8x32xf32>
    %cst_20 = arith.constant 1.000000e+00 : f32
    %24 = vector.broadcast %cst_20 : f32 to vector<8x32xf32>
    %25 = arith.addf %24, %23 : vector<8x32xf32>
    %26 = arith.divf %24, %25 : vector<8x32xf32>
    %27 = vector.extract_strided_slice %20 {offsets = [0, 32], sizes = [8, 32], strides = [1, 1]} : vector<8x128xf32> to vector<8x32xf32>
    %28 = arith.negf %27 : vector<8x32xf32>
    %29 = math.exp %28 : vector<8x32xf32>
    %cst_21 = arith.constant 1.000000e+00 : f32
    %30 = vector.broadcast %cst_21 : f32 to vector<8x32xf32>
    %31 = arith.addf %30, %29 : vector<8x32xf32>
    %32 = arith.divf %30, %31 : vector<8x32xf32>
    %33 = vector.extract_strided_slice %20 {offsets = [0, 64], sizes = [8, 32], strides = [1, 1]} : vector<8x128xf32> to vector<8x32xf32>
    %34 = math.tanh %33 : vector<8x32xf32>
    %35 = vector.extract_strided_slice %20 {offsets = [0, 96], sizes = [8, 32], strides = [1, 1]} : vector<8x128xf32> to vector<8x32xf32>
    %36 = arith.negf %35 : vector<8x32xf32>
    %37 = math.exp %36 : vector<8x32xf32>
    %cst_22 = arith.constant 1.000000e+00 : f32
    %38 = vector.broadcast %cst_22 : f32 to vector<8x32xf32>
    %39 = arith.addf %38, %37 : vector<8x32xf32>
    %40 = arith.divf %38, %39 : vector<8x32xf32>
    %41 = arith.mulf %32, %15 : vector<8x32xf32>
    %42 = arith.mulf %26, %34 : vector<8x32xf32>
    %43 = arith.addf %41, %42 : vector<8x32xf32>
    %44 = math.tanh %43 : vector<8x32xf32>
    %45 = arith.mulf %40, %44 : vector<8x32xf32>
    %c0_i32_23 = arith.constant 0 : i32
    %46 = arith.addi %13, %c0_i32_23 : i32
    %c14_i32 = arith.constant 14 : i32
    %47 = arith.cmpi slt, %46, %c14_i32 : i32
    %48 = arith.select %47, %45, %14 : vector<8x32xf32>
    %49 = arith.select %47, %43, %15 : vector<8x32xf32>
    %c1 = arith.constant 1 : index
    %c0_24 = arith.constant 0 : index
    %c0_25 = arith.constant 0 : index
    %50 = vector.load %arg11[%c1, %c0_24, %c0_25] : memref<8x8x128xf32, #tpu.memory_space<vmem>>, vector<1x8x128xf32>
    %51 = vector.shape_cast %50 : vector<1x8x128xf32> to vector<8x128xf32>
    %52 = arith.truncf %48 : vector<8x32xf32> to vector<8x32xbf16>
    %cst_26 = arith.constant dense<0.000000e+00> : vector<8x128xf32>
    %53 = tpu.matmul %52, %12, %cst_26 {dimension_numbers = #tpu.dot_dimension_numbers<[1], [0], [0], [1], [0, 0, 1, 1], [], []>} : vector<8x32xbf16>, vector<32x128xbf16>, vector<8x128xf32> -> vector<8x128xf32>
    %54 = arith.addf %51, %53 : vector<8x128xf32>
    %55 = vector.extract_strided_slice %54 {offsets = [0, 0], sizes = [8, 32], strides = [1, 1]} : vector<8x128xf32> to vector<8x32xf32>
    %56 = arith.negf %55 : vector<8x32xf32>
    %57 = math.exp %56 : vector<8x32xf32>
    %cst_27 = arith.constant 1.000000e+00 : f32
    %58 = vector.broadcast %cst_27 : f32 to vector<8x32xf32>
    %59 = arith.addf %58, %57 : vector<8x32xf32>
    %60 = arith.divf %58, %59 : vector<8x32xf32>
    %61 = vector.extract_strided_slice %54 {offsets = [0, 32], sizes = [8, 32], strides = [1, 1]} : vector<8x128xf32> to vector<8x32xf32>
    %62 = arith.negf %61 : vector<8x32xf32>
    %63 = math.exp %62 : vector<8x32xf32>
    %cst_28 = arith.constant 1.000000e+00 : f32
    %64 = vector.broadcast %cst_28 : f32 to vector<8x32xf32>
    %65 = arith.addf %64, %63 : vector<8x32xf32>
    %66 = arith.divf %64, %65 : vector<8x32xf32>
    %67 = vector.extract_strided_slice %54 {offsets = [0, 64], sizes = [8, 32], strides = [1, 1]} : vector<8x128xf32> to vector<8x32xf32>
    %68 = math.tanh %67 : vector<8x32xf32>
    %69 = vector.extract_strided_slice %54 {offsets = [0, 96], sizes = [8, 32], strides = [1, 1]} : vector<8x128xf32> to vector<8x32xf32>
    %70 = arith.negf %69 : vector<8x32xf32>
    %71 = math.exp %70 : vector<8x32xf32>
    %cst_29 = arith.constant 1.000000e+00 : f32
    %72 = vector.broadcast %cst_29 : f32 to vector<8x32xf32>
    %73 = arith.addf %72, %71 : vector<8x32xf32>
    %74 = arith.divf %72, %73 : vector<8x32xf32>
    %75 = arith.mulf %66, %49 : vector<8x32xf32>
    %76 = arith.mulf %60, %68 : vector<8x32xf32>
    %77 = arith.addf %75, %76 : vector<8x32xf32>
    %78 = math.tanh %77 : vector<8x32xf32>
    %79 = arith.mulf %74, %78 : vector<8x32xf32>
    %c1_i32 = arith.constant 1 : i32
    %80 = arith.addi %13, %c1_i32 : i32
    %c14_i32_30 = arith.constant 14 : i32
    %81 = arith.cmpi slt, %80, %c14_i32_30 : i32
    %82 = arith.select %81, %79, %48 : vector<8x32xf32>
    %83 = arith.select %81, %77, %49 : vector<8x32xf32>
    %c2 = arith.constant 2 : index
    %c0_31 = arith.constant 0 : index
    %c0_32 = arith.constant 0 : index
    %84 = vector.load %arg11[%c2, %c0_31, %c0_32] : memref<8x8x128xf32, #tpu.memory_space<vmem>>, vector<1x8x128xf32>
    %85 = vector.shape_cast %84 : vector<1x8x128xf32> to vector<8x128xf32>
    %86 = arith.truncf %82 : vector<8x32xf32> to vector<8x32xbf16>
    %cst_33 = arith.constant dense<0.000000e+00> : vector<8x128xf32>
    %87 = tpu.matmul %86, %12, %cst_33 {dimension_numbers = #tpu.dot_dimension_numbers<[1], [0], [0], [1], [0, 0, 1, 1], [], []>} : vector<8x32xbf16>, vector<32x128xbf16>, vector<8x128xf32> -> vector<8x128xf32>
    %88 = arith.addf %85, %87 : vector<8x128xf32>
    %89 = vector.extract_strided_slice %88 {offsets = [0, 0], sizes = [8, 32], strides = [1, 1]} : vector<8x128xf32> to vector<8x32xf32>
    %90 = arith.negf %89 : vector<8x32xf32>
    %91 = math.exp %90 : vector<8x32xf32>
    %cst_34 = arith.constant 1.000000e+00 : f32
    %92 = vector.broadcast %cst_34 : f32 to vector<8x32xf32>
    %93 = arith.addf %92, %91 : vector<8x32xf32>
    %94 = arith.divf %92, %93 : vector<8x32xf32>
    %95 = vector.extract_strided_slice %88 {offsets = [0, 32], sizes = [8, 32], strides = [1, 1]} : vector<8x128xf32> to vector<8x32xf32>
    %96 = arith.negf %95 : vector<8x32xf32>
    %97 = math.exp %96 : vector<8x32xf32>
    %cst_35 = arith.constant 1.000000e+00 : f32
    %98 = vector.broadcast %cst_35 : f32 to vector<8x32xf32>
    %99 = arith.addf %98, %97 : vector<8x32xf32>
    %100 = arith.divf %98, %99 : vector<8x32xf32>
    %101 = vector.extract_strided_slice %88 {offsets = [0, 64], sizes = [8, 32], strides = [1, 1]} : vector<8x128xf32> to vector<8x32xf32>
    %102 = math.tanh %101 : vector<8x32xf32>
    %103 = vector.extract_strided_slice %88 {offsets = [0, 96], sizes = [8, 32], strides = [1, 1]} : vector<8x128xf32> to vector<8x32xf32>
    %104 = arith.negf %103 : vector<8x32xf32>
    %105 = math.exp %104 : vector<8x32xf32>
    %cst_36 = arith.constant 1.000000e+00 : f32
    %106 = vector.broadcast %cst_36 : f32 to vector<8x32xf32>
    %107 = arith.addf %106, %105 : vector<8x32xf32>
    %108 = arith.divf %106, %107 : vector<8x32xf32>
    %109 = arith.mulf %100, %83 : vector<8x32xf32>
    %110 = arith.mulf %94, %102 : vector<8x32xf32>
    %111 = arith.addf %109, %110 : vector<8x32xf32>
    %112 = math.tanh %111 : vector<8x32xf32>
    %113 = arith.mulf %108, %112 : vector<8x32xf32>
    %c2_i32 = arith.constant 2 : i32
    %114 = arith.addi %13, %c2_i32 : i32
    %c14_i32_37 = arith.constant 14 : i32
    %115 = arith.cmpi slt, %114, %c14_i32_37 : i32
    %116 = arith.select %115, %113, %82 : vector<8x32xf32>
    %117 = arith.select %115, %111, %83 : vector<8x32xf32>
    %c3 = arith.constant 3 : index
    %c0_38 = arith.constant 0 : index
    %c0_39 = arith.constant 0 : index
    %118 = vector.load %arg11[%c3, %c0_38, %c0_39] : memref<8x8x128xf32, #tpu.memory_space<vmem>>, vector<1x8x128xf32>
    %119 = vector.shape_cast %118 : vector<1x8x128xf32> to vector<8x128xf32>
    %120 = arith.truncf %116 : vector<8x32xf32> to vector<8x32xbf16>
    %cst_40 = arith.constant dense<0.000000e+00> : vector<8x128xf32>
    %121 = tpu.matmul %120, %12, %cst_40 {dimension_numbers = #tpu.dot_dimension_numbers<[1], [0], [0], [1], [0, 0, 1, 1], [], []>} : vector<8x32xbf16>, vector<32x128xbf16>, vector<8x128xf32> -> vector<8x128xf32>
    %122 = arith.addf %119, %121 : vector<8x128xf32>
    %123 = vector.extract_strided_slice %122 {offsets = [0, 0], sizes = [8, 32], strides = [1, 1]} : vector<8x128xf32> to vector<8x32xf32>
    %124 = arith.negf %123 : vector<8x32xf32>
    %125 = math.exp %124 : vector<8x32xf32>
    %cst_41 = arith.constant 1.000000e+00 : f32
    %126 = vector.broadcast %cst_41 : f32 to vector<8x32xf32>
    %127 = arith.addf %126, %125 : vector<8x32xf32>
    %128 = arith.divf %126, %127 : vector<8x32xf32>
    %129 = vector.extract_strided_slice %122 {offsets = [0, 32], sizes = [8, 32], strides = [1, 1]} : vector<8x128xf32> to vector<8x32xf32>
    %130 = arith.negf %129 : vector<8x32xf32>
    %131 = math.exp %130 : vector<8x32xf32>
    %cst_42 = arith.constant 1.000000e+00 : f32
    %132 = vector.broadcast %cst_42 : f32 to vector<8x32xf32>
    %133 = arith.addf %132, %131 : vector<8x32xf32>
    %134 = arith.divf %132, %133 : vector<8x32xf32>
    %135 = vector.extract_strided_slice %122 {offsets = [0, 64], sizes = [8, 32], strides = [1, 1]} : vector<8x128xf32> to vector<8x32xf32>
    %136 = math.tanh %135 : vector<8x32xf32>
    %137 = vector.extract_strided_slice %122 {offsets = [0, 96], sizes = [8, 32], strides = [1, 1]} : vector<8x128xf32> to vector<8x32xf32>
    %138 = arith.negf %137 : vector<8x32xf32>
    %139 = math.exp %138 : vector<8x32xf32>
    %cst_43 = arith.constant 1.000000e+00 : f32
    %140 = vector.broadcast %cst_43 : f32 to vector<8x32xf32>
    %141 = arith.addf %140, %139 : vector<8x32xf32>
    %142 = arith.divf %140, %141 : vector<8x32xf32>
    %143 = arith.mulf %134, %117 : vector<8x32xf32>
    %144 = arith.mulf %128, %136 : vector<8x32xf32>
    %145 = arith.addf %143, %144 : vector<8x32xf32>
    %146 = math.tanh %145 : vector<8x32xf32>
    %147 = arith.mulf %142, %146 : vector<8x32xf32>
    %c3_i32 = arith.constant 3 : i32
    %148 = arith.addi %13, %c3_i32 : i32
    %c14_i32_44 = arith.constant 14 : i32
    %149 = arith.cmpi slt, %148, %c14_i32_44 : i32
    %150 = arith.select %149, %147, %116 : vector<8x32xf32>
    %151 = arith.select %149, %145, %117 : vector<8x32xf32>
    %c4 = arith.constant 4 : index
    %c0_45 = arith.constant 0 : index
    %c0_46 = arith.constant 0 : index
    %152 = vector.load %arg11[%c4, %c0_45, %c0_46] : memref<8x8x128xf32, #tpu.memory_space<vmem>>, vector<1x8x128xf32>
    %153 = vector.shape_cast %152 : vector<1x8x128xf32> to vector<8x128xf32>
    %154 = arith.truncf %150 : vector<8x32xf32> to vector<8x32xbf16>
    %cst_47 = arith.constant dense<0.000000e+00> : vector<8x128xf32>
    %155 = tpu.matmul %154, %12, %cst_47 {dimension_numbers = #tpu.dot_dimension_numbers<[1], [0], [0], [1], [0, 0, 1, 1], [], []>} : vector<8x32xbf16>, vector<32x128xbf16>, vector<8x128xf32> -> vector<8x128xf32>
    %156 = arith.addf %153, %155 : vector<8x128xf32>
    %157 = vector.extract_strided_slice %156 {offsets = [0, 0], sizes = [8, 32], strides = [1, 1]} : vector<8x128xf32> to vector<8x32xf32>
    %158 = arith.negf %157 : vector<8x32xf32>
    %159 = math.exp %158 : vector<8x32xf32>
    %cst_48 = arith.constant 1.000000e+00 : f32
    %160 = vector.broadcast %cst_48 : f32 to vector<8x32xf32>
    %161 = arith.addf %160, %159 : vector<8x32xf32>
    %162 = arith.divf %160, %161 : vector<8x32xf32>
    %163 = vector.extract_strided_slice %156 {offsets = [0, 32], sizes = [8, 32], strides = [1, 1]} : vector<8x128xf32> to vector<8x32xf32>
    %164 = arith.negf %163 : vector<8x32xf32>
    %165 = math.exp %164 : vector<8x32xf32>
    %cst_49 = arith.constant 1.000000e+00 : f32
    %166 = vector.broadcast %cst_49 : f32 to vector<8x32xf32>
    %167 = arith.addf %166, %165 : vector<8x32xf32>
    %168 = arith.divf %166, %167 : vector<8x32xf32>
    %169 = vector.extract_strided_slice %156 {offsets = [0, 64], sizes = [8, 32], strides = [1, 1]} : vector<8x128xf32> to vector<8x32xf32>
    %170 = math.tanh %169 : vector<8x32xf32>
    %171 = vector.extract_strided_slice %156 {offsets = [0, 96], sizes = [8, 32], strides = [1, 1]} : vector<8x128xf32> to vector<8x32xf32>
    %172 = arith.negf %171 : vector<8x32xf32>
    %173 = math.exp %172 : vector<8x32xf32>
    %cst_50 = arith.constant 1.000000e+00 : f32
    %174 = vector.broadcast %cst_50 : f32 to vector<8x32xf32>
    %175 = arith.addf %174, %173 : vector<8x32xf32>
    %176 = arith.divf %174, %175 : vector<8x32xf32>
    %177 = arith.mulf %168, %151 : vector<8x32xf32>
    %178 = arith.mulf %162, %170 : vector<8x32xf32>
    %179 = arith.addf %177, %178 : vector<8x32xf32>
    %180 = math.tanh %179 : vector<8x32xf32>
    %181 = arith.mulf %176, %180 : vector<8x32xf32>
    %c4_i32 = arith.constant 4 : i32
    %182 = arith.addi %13, %c4_i32 : i32
    %c14_i32_51 = arith.constant 14 : i32
    %183 = arith.cmpi slt, %182, %c14_i32_51 : i32
    %184 = arith.select %183, %181, %150 : vector<8x32xf32>
    %185 = arith.select %183, %179, %151 : vector<8x32xf32>
    %c5 = arith.constant 5 : index
    %c0_52 = arith.constant 0 : index
    %c0_53 = arith.constant 0 : index
    %186 = vector.load %arg11[%c5, %c0_52, %c0_53] : memref<8x8x128xf32, #tpu.memory_space<vmem>>, vector<1x8x128xf32>
    %187 = vector.shape_cast %186 : vector<1x8x128xf32> to vector<8x128xf32>
    %188 = arith.truncf %184 : vector<8x32xf32> to vector<8x32xbf16>
    %cst_54 = arith.constant dense<0.000000e+00> : vector<8x128xf32>
    %189 = tpu.matmul %188, %12, %cst_54 {dimension_numbers = #tpu.dot_dimension_numbers<[1], [0], [0], [1], [0, 0, 1, 1], [], []>} : vector<8x32xbf16>, vector<32x128xbf16>, vector<8x128xf32> -> vector<8x128xf32>
    %190 = arith.addf %187, %189 : vector<8x128xf32>
    %191 = vector.extract_strided_slice %190 {offsets = [0, 0], sizes = [8, 32], strides = [1, 1]} : vector<8x128xf32> to vector<8x32xf32>
    %192 = arith.negf %191 : vector<8x32xf32>
    %193 = math.exp %192 : vector<8x32xf32>
    %cst_55 = arith.constant 1.000000e+00 : f32
    %194 = vector.broadcast %cst_55 : f32 to vector<8x32xf32>
    %195 = arith.addf %194, %193 : vector<8x32xf32>
    %196 = arith.divf %194, %195 : vector<8x32xf32>
    %197 = vector.extract_strided_slice %190 {offsets = [0, 32], sizes = [8, 32], strides = [1, 1]} : vector<8x128xf32> to vector<8x32xf32>
    %198 = arith.negf %197 : vector<8x32xf32>
    %199 = math.exp %198 : vector<8x32xf32>
    %cst_56 = arith.constant 1.000000e+00 : f32
    %200 = vector.broadcast %cst_56 : f32 to vector<8x32xf32>
    %201 = arith.addf %200, %199 : vector<8x32xf32>
    %202 = arith.divf %200, %201 : vector<8x32xf32>
    %203 = vector.extract_strided_slice %190 {offsets = [0, 64], sizes = [8, 32], strides = [1, 1]} : vector<8x128xf32> to vector<8x32xf32>
    %204 = math.tanh %203 : vector<8x32xf32>
    %205 = vector.extract_strided_slice %190 {offsets = [0, 96], sizes = [8, 32], strides = [1, 1]} : vector<8x128xf32> to vector<8x32xf32>
    %206 = arith.negf %205 : vector<8x32xf32>
    %207 = math.exp %206 : vector<8x32xf32>
    %cst_57 = arith.constant 1.000000e+00 : f32
    %208 = vector.broadcast %cst_57 : f32 to vector<8x32xf32>
    %209 = arith.addf %208, %207 : vector<8x32xf32>
    %210 = arith.divf %208, %209 : vector<8x32xf32>
    %211 = arith.mulf %202, %185 : vector<8x32xf32>
    %212 = arith.mulf %196, %204 : vector<8x32xf32>
    %213 = arith.addf %211, %212 : vector<8x32xf32>
    %214 = math.tanh %213 : vector<8x32xf32>
    %215 = arith.mulf %210, %214 : vector<8x32xf32>
    %c5_i32 = arith.constant 5 : i32
    %216 = arith.addi %13, %c5_i32 : i32
    %c14_i32_58 = arith.constant 14 : i32
    %217 = arith.cmpi slt, %216, %c14_i32_58 : i32
    %218 = arith.select %217, %215, %184 : vector<8x32xf32>
    %219 = arith.select %217, %213, %185 : vector<8x32xf32>
    %c6 = arith.constant 6 : index
    %c0_59 = arith.constant 0 : index
    %c0_60 = arith.constant 0 : index
    %220 = vector.load %arg11[%c6, %c0_59, %c0_60] : memref<8x8x128xf32, #tpu.memory_space<vmem>>, vector<1x8x128xf32>
    %221 = vector.shape_cast %220 : vector<1x8x128xf32> to vector<8x128xf32>
    %222 = arith.truncf %218 : vector<8x32xf32> to vector<8x32xbf16>
    %cst_61 = arith.constant dense<0.000000e+00> : vector<8x128xf32>
    %223 = tpu.matmul %222, %12, %cst_61 {dimension_numbers = #tpu.dot_dimension_numbers<[1], [0], [0], [1], [0, 0, 1, 1], [], []>} : vector<8x32xbf16>, vector<32x128xbf16>, vector<8x128xf32> -> vector<8x128xf32>
    %224 = arith.addf %221, %223 : vector<8x128xf32>
    %225 = vector.extract_strided_slice %224 {offsets = [0, 0], sizes = [8, 32], strides = [1, 1]} : vector<8x128xf32> to vector<8x32xf32>
    %226 = arith.negf %225 : vector<8x32xf32>
    %227 = math.exp %226 : vector<8x32xf32>
    %cst_62 = arith.constant 1.000000e+00 : f32
    %228 = vector.broadcast %cst_62 : f32 to vector<8x32xf32>
    %229 = arith.addf %228, %227 : vector<8x32xf32>
    %230 = arith.divf %228, %229 : vector<8x32xf32>
    %231 = vector.extract_strided_slice %224 {offsets = [0, 32], sizes = [8, 32], strides = [1, 1]} : vector<8x128xf32> to vector<8x32xf32>
    %232 = arith.negf %231 : vector<8x32xf32>
    %233 = math.exp %232 : vector<8x32xf32>
    %cst_63 = arith.constant 1.000000e+00 : f32
    %234 = vector.broadcast %cst_63 : f32 to vector<8x32xf32>
    %235 = arith.addf %234, %233 : vector<8x32xf32>
    %236 = arith.divf %234, %235 : vector<8x32xf32>
    %237 = vector.extract_strided_slice %224 {offsets = [0, 64], sizes = [8, 32], strides = [1, 1]} : vector<8x128xf32> to vector<8x32xf32>
    %238 = math.tanh %237 : vector<8x32xf32>
    %239 = vector.extract_strided_slice %224 {offsets = [0, 96], sizes = [8, 32], strides = [1, 1]} : vector<8x128xf32> to vector<8x32xf32>
    %240 = arith.negf %239 : vector<8x32xf32>
    %241 = math.exp %240 : vector<8x32xf32>
    %cst_64 = arith.constant 1.000000e+00 : f32
    %242 = vector.broadcast %cst_64 : f32 to vector<8x32xf32>
    %243 = arith.addf %242, %241 : vector<8x32xf32>
    %244 = arith.divf %242, %243 : vector<8x32xf32>
    %245 = arith.mulf %236, %219 : vector<8x32xf32>
    %246 = arith.mulf %230, %238 : vector<8x32xf32>
    %247 = arith.addf %245, %246 : vector<8x32xf32>
    %248 = math.tanh %247 : vector<8x32xf32>
    %249 = arith.mulf %244, %248 : vector<8x32xf32>
    %c6_i32 = arith.constant 6 : i32
    %250 = arith.addi %13, %c6_i32 : i32
    %c14_i32_65 = arith.constant 14 : i32
    %251 = arith.cmpi slt, %250, %c14_i32_65 : i32
    %252 = arith.select %251, %249, %218 : vector<8x32xf32>
    %253 = arith.select %251, %247, %219 : vector<8x32xf32>
    %c7 = arith.constant 7 : index
    %c0_66 = arith.constant 0 : index
    %c0_67 = arith.constant 0 : index
    %254 = vector.load %arg11[%c7, %c0_66, %c0_67] : memref<8x8x128xf32, #tpu.memory_space<vmem>>, vector<1x8x128xf32>
    %255 = vector.shape_cast %254 : vector<1x8x128xf32> to vector<8x128xf32>
    %256 = arith.truncf %252 : vector<8x32xf32> to vector<8x32xbf16>
    %cst_68 = arith.constant dense<0.000000e+00> : vector<8x128xf32>
    %257 = tpu.matmul %256, %12, %cst_68 {dimension_numbers = #tpu.dot_dimension_numbers<[1], [0], [0], [1], [0, 0, 1, 1], [], []>} : vector<8x32xbf16>, vector<32x128xbf16>, vector<8x128xf32> -> vector<8x128xf32>
    %258 = arith.addf %255, %257 : vector<8x128xf32>
    %259 = vector.extract_strided_slice %258 {offsets = [0, 0], sizes = [8, 32], strides = [1, 1]} : vector<8x128xf32> to vector<8x32xf32>
    %260 = arith.negf %259 : vector<8x32xf32>
    %261 = math.exp %260 : vector<8x32xf32>
    %cst_69 = arith.constant 1.000000e+00 : f32
    %262 = vector.broadcast %cst_69 : f32 to vector<8x32xf32>
    %263 = arith.addf %262, %261 : vector<8x32xf32>
    %264 = arith.divf %262, %263 : vector<8x32xf32>
    %265 = vector.extract_strided_slice %258 {offsets = [0, 32], sizes = [8, 32], strides = [1, 1]} : vector<8x128xf32> to vector<8x32xf32>
    %266 = arith.negf %265 : vector<8x32xf32>
    %267 = math.exp %266 : vector<8x32xf32>
    %cst_70 = arith.constant 1.000000e+00 : f32
    %268 = vector.broadcast %cst_70 : f32 to vector<8x32xf32>
    %269 = arith.addf %268, %267 : vector<8x32xf32>
    %270 = arith.divf %268, %269 : vector<8x32xf32>
    %271 = vector.extract_strided_slice %258 {offsets = [0, 64], sizes = [8, 32], strides = [1, 1]} : vector<8x128xf32> to vector<8x32xf32>
    %272 = math.tanh %271 : vector<8x32xf32>
    %273 = vector.extract_strided_slice %258 {offsets = [0, 96], sizes = [8, 32], strides = [1, 1]} : vector<8x128xf32> to vector<8x32xf32>
    %274 = arith.negf %273 : vector<8x32xf32>
    %275 = math.exp %274 : vector<8x32xf32>
    %cst_71 = arith.constant 1.000000e+00 : f32
    %276 = vector.broadcast %cst_71 : f32 to vector<8x32xf32>
    %277 = arith.addf %276, %275 : vector<8x32xf32>
    %278 = arith.divf %276, %277 : vector<8x32xf32>
    %279 = arith.mulf %270, %253 : vector<8x32xf32>
    %280 = arith.mulf %264, %272 : vector<8x32xf32>
    %281 = arith.addf %279, %280 : vector<8x32xf32>
    %282 = math.tanh %281 : vector<8x32xf32>
    %283 = arith.mulf %278, %282 : vector<8x32xf32>
    %c7_i32 = arith.constant 7 : i32
    %284 = arith.addi %13, %c7_i32 : i32
    %c14_i32_72 = arith.constant 14 : i32
    %285 = arith.cmpi slt, %284, %c14_i32_72 : i32
    %286 = arith.select %285, %283, %252 : vector<8x32xf32>
    %287 = arith.select %285, %281, %253 : vector<8x32xf32>
    %c0_73 = arith.constant 0 : index
    %c0_74 = arith.constant 0 : index
    %288 = vector.load %arg9[%c0_73, %c0_74] : memref<8x32xf32, #tpu.memory_space<vmem>>, vector<8x32xf32>
    tpu.vector_store %arg9[%c0_73, %c0_74], %286 {strides = array<i32>} : memref<8x32xf32, #tpu.memory_space<vmem>>, vector<8x32xf32>,
    %c0_75 = arith.constant 0 : index
    %c0_76 = arith.constant 0 : index
    %289 = vector.load %arg10[%c0_75, %c0_76] : memref<8x32xf32, #tpu.memory_space<vmem>>, vector<8x32xf32>
    tpu.vector_store %arg10[%c0_75, %c0_76], %287 {strides = array<i32>} : memref<8x32xf32, #tpu.memory_space<vmem>>, vector<8x32xf32>,
    %c1_i32_77 = arith.constant 1 : i32
    %290 = arith.cmpi eq, %arg1, %c1_i32_77 : i32
    %291 = arith.extui %290 : i1 to i32
    %c0_i32_78 = arith.constant 0 : i32
    %292 = arith.cmpi ne, %291, %c0_i32_78 : i32
    scf.if %292 {
      %c0_79 = arith.constant 0 : index
      %c0_80 = arith.constant 0 : index
      %293 = vector.load %arg6[%c0_79, %c0_80] : memref<32x128xbf16, #tpu.memory_space<vmem>>, vector<32x128xbf16>
      %c0_81 = arith.constant 0 : index
      %c0_82 = arith.constant 0 : index
      %294 = vector.load %arg7[%c0_81, %c0_82] : memref<1x128xf32, #tpu.memory_space<vmem>>, vector<1x128xf32>
      %295 = arith.truncf %286 : vector<8x32xf32> to vector<8x32xbf16>
      %cst_83 = arith.constant dense<0.000000e+00> : vector<8x128xf32>
      %296 = tpu.matmul %295, %293, %cst_83 {dimension_numbers = #tpu.dot_dimension_numbers<[1], [0], [0], [1], [0, 0, 1, 1], [], []>} : vector<8x32xbf16>, vector<32x128xbf16>, vector<8x128xf32> -> vector<8x128xf32>
      %297 = vector.broadcast %294 : vector<1x128xf32> to vector<8x128xf32>
      %298 = arith.addf %296, %297 : vector<8x128xf32>
      %299 = vector.extract_strided_slice %298 {offsets = [0, 0], sizes = [8, 32], strides = [1, 1]} : vector<8x128xf32> to vector<8x32xf32>
      %300 = arith.negf %299 : vector<8x32xf32>
      %301 = math.exp %300 : vector<8x32xf32>
      %cst_84 = arith.constant 1.000000e+00 : f32
      %302 = vector.broadcast %cst_84 : f32 to vector<8x32xf32>
      %303 = arith.addf %302, %301 : vector<8x32xf32>
      %304 = arith.divf %302, %303 : vector<8x32xf32>
      %305 = vector.extract_strided_slice %298 {offsets = [0, 32], sizes = [8, 32], strides = [1, 1]} : vector<8x128xf32> to vector<8x32xf32>
      %306 = arith.negf %305 : vector<8x32xf32>
      %307 = math.exp %306 : vector<8x32xf32>
      %cst_85 = arith.constant 1.000000e+00 : f32
      %308 = vector.broadcast %cst_85 : f32 to vector<8x32xf32>
      %309 = arith.addf %308, %307 : vector<8x32xf32>
      %310 = arith.divf %308, %309 : vector<8x32xf32>
      %311 = vector.extract_strided_slice %298 {offsets = [0, 64], sizes = [8, 32], strides = [1, 1]} : vector<8x128xf32> to vector<8x32xf32>
      %312 = math.tanh %311 : vector<8x32xf32>
      %313 = vector.extract_strided_slice %298 {offsets = [0, 96], sizes = [8, 32], strides = [1, 1]} : vector<8x128xf32> to vector<8x32xf32>
      %314 = arith.negf %313 : vector<8x32xf32>
      %315 = math.exp %314 : vector<8x32xf32>
      %cst_86 = arith.constant 1.000000e+00 : f32
      %316 = vector.broadcast %cst_86 : f32 to vector<8x32xf32>
      %317 = arith.addf %316, %315 : vector<8x32xf32>
      %318 = arith.divf %316, %317 : vector<8x32xf32>
      %319 = arith.mulf %310, %287 : vector<8x32xf32>
      %320 = arith.mulf %304, %312 : vector<8x32xf32>
      %321 = arith.addf %319, %320 : vector<8x32xf32>
      %322 = math.tanh %321 : vector<8x32xf32>
      %323 = arith.mulf %318, %322 : vector<8x32xf32>
      %c0_87 = arith.constant 0 : index
      %c0_88 = arith.constant 0 : index
      %c0_89 = arith.constant 0 : index
      %324 = vector.load %arg8[%c0_87, %c0_88, %c0_89] : memref<5x8x32xf32, #tpu.memory_space<vmem>>, vector<1x8x32xf32>
      %325 = vector.shape_cast %324 : vector<1x8x32xf32> to vector<8x32xf32>
      %326 = vector.shape_cast %323 : vector<8x32xf32> to vector<1x8x32xf32>
      tpu.vector_store %arg8[%c0_87, %c0_88, %c0_89], %326 {strides = array<i32>} : memref<5x8x32xf32, #tpu.memory_space<vmem>>, vector<1x8x32xf32>,
      %327 = arith.truncf %323 : vector<8x32xf32> to vector<8x32xbf16>
      %cst_90 = arith.constant dense<0.000000e+00> : vector<8x128xf32>
      %328 = tpu.matmul %327, %293, %cst_90 {dimension_numbers = #tpu.dot_dimension_numbers<[1], [0], [0], [1], [0, 0, 1, 1], [], []>} : vector<8x32xbf16>, vector<32x128xbf16>, vector<8x128xf32> -> vector<8x128xf32>
      %329 = vector.broadcast %294 : vector<1x128xf32> to vector<8x128xf32>
      %330 = arith.addf %328, %329 : vector<8x128xf32>
      %331 = vector.extract_strided_slice %330 {offsets = [0, 0], sizes = [8, 32], strides = [1, 1]} : vector<8x128xf32> to vector<8x32xf32>
      %332 = arith.negf %331 : vector<8x32xf32>
      %333 = math.exp %332 : vector<8x32xf32>
      %cst_91 = arith.constant 1.000000e+00 : f32
      %334 = vector.broadcast %cst_91 : f32 to vector<8x32xf32>
      %335 = arith.addf %334, %333 : vector<8x32xf32>
      %336 = arith.divf %334, %335 : vector<8x32xf32>
      %337 = vector.extract_strided_slice %330 {offsets = [0, 32], sizes = [8, 32], strides = [1, 1]} : vector<8x128xf32> to vector<8x32xf32>
      %338 = arith.negf %337 : vector<8x32xf32>
      %339 = math.exp %338 : vector<8x32xf32>
      %cst_92 = arith.constant 1.000000e+00 : f32
      %340 = vector.broadcast %cst_92 : f32 to vector<8x32xf32>
      %341 = arith.addf %340, %339 : vector<8x32xf32>
      %342 = arith.divf %340, %341 : vector<8x32xf32>
      %343 = vector.extract_strided_slice %330 {offsets = [0, 64], sizes = [8, 32], strides = [1, 1]} : vector<8x128xf32> to vector<8x32xf32>
      %344 = math.tanh %343 : vector<8x32xf32>
      %345 = vector.extract_strided_slice %330 {offsets = [0, 96], sizes = [8, 32], strides = [1, 1]} : vector<8x128xf32> to vector<8x32xf32>
      %346 = arith.negf %345 : vector<8x32xf32>
      %347 = math.exp %346 : vector<8x32xf32>
      %cst_93 = arith.constant 1.000000e+00 : f32
      %348 = vector.broadcast %cst_93 : f32 to vector<8x32xf32>
      %349 = arith.addf %348, %347 : vector<8x32xf32>
      %350 = arith.divf %348, %349 : vector<8x32xf32>
      %351 = arith.mulf %342, %321 : vector<8x32xf32>
      %352 = arith.mulf %336, %344 : vector<8x32xf32>
      %353 = arith.addf %351, %352 : vector<8x32xf32>
      %354 = math.tanh %353 : vector<8x32xf32>
      %355 = arith.mulf %350, %354 : vector<8x32xf32>
      %c1_94 = arith.constant 1 : index
      %c0_95 = arith.constant 0 : index
      %c0_96 = arith.constant 0 : index
      %356 = vector.load %arg8[%c1_94, %c0_95, %c0_96] : memref<5x8x32xf32, #tpu.memory_space<vmem>>, vector<1x8x32xf32>
      %357 = vector.shape_cast %356 : vector<1x8x32xf32> to vector<8x32xf32>
      %358 = vector.shape_cast %355 : vector<8x32xf32> to vector<1x8x32xf32>
      tpu.vector_store %arg8[%c1_94, %c0_95, %c0_96], %358 {strides = array<i32>} : memref<5x8x32xf32, #tpu.memory_space<vmem>>, vector<1x8x32xf32>,
      %359 = arith.truncf %355 : vector<8x32xf32> to vector<8x32xbf16>
      %cst_97 = arith.constant dense<0.000000e+00> : vector<8x128xf32>
      %360 = tpu.matmul %359, %293, %cst_97 {dimension_numbers = #tpu.dot_dimension_numbers<[1], [0], [0], [1], [0, 0, 1, 1], [], []>} : vector<8x32xbf16>, vector<32x128xbf16>, vector<8x128xf32> -> vector<8x128xf32>
      %361 = vector.broadcast %294 : vector<1x128xf32> to vector<8x128xf32>
      %362 = arith.addf %360, %361 : vector<8x128xf32>
      %363 = vector.extract_strided_slice %362 {offsets = [0, 0], sizes = [8, 32], strides = [1, 1]} : vector<8x128xf32> to vector<8x32xf32>
      %364 = arith.negf %363 : vector<8x32xf32>
      %365 = math.exp %364 : vector<8x32xf32>
      %cst_98 = arith.constant 1.000000e+00 : f32
      %366 = vector.broadcast %cst_98 : f32 to vector<8x32xf32>
      %367 = arith.addf %366, %365 : vector<8x32xf32>
      %368 = arith.divf %366, %367 : vector<8x32xf32>
      %369 = vector.extract_strided_slice %362 {offsets = [0, 32], sizes = [8, 32], strides = [1, 1]} : vector<8x128xf32> to vector<8x32xf32>
      %370 = arith.negf %369 : vector<8x32xf32>
      %371 = math.exp %370 : vector<8x32xf32>
      %cst_99 = arith.constant 1.000000e+00 : f32
      %372 = vector.broadcast %cst_99 : f32 to vector<8x32xf32>
      %373 = arith.addf %372, %371 : vector<8x32xf32>
      %374 = arith.divf %372, %373 : vector<8x32xf32>
      %375 = vector.extract_strided_slice %362 {offsets = [0, 64], sizes = [8, 32], strides = [1, 1]} : vector<8x128xf32> to vector<8x32xf32>
      %376 = math.tanh %375 : vector<8x32xf32>
      %377 = vector.extract_strided_slice %362 {offsets = [0, 96], sizes = [8, 32], strides = [1, 1]} : vector<8x128xf32> to vector<8x32xf32>
      %378 = arith.negf %377 : vector<8x32xf32>
      %379 = math.exp %378 : vector<8x32xf32>
      %cst_100 = arith.constant 1.000000e+00 : f32
      %380 = vector.broadcast %cst_100 : f32 to vector<8x32xf32>
      %381 = arith.addf %380, %379 : vector<8x32xf32>
      %382 = arith.divf %380, %381 : vector<8x32xf32>
      %383 = arith.mulf %374, %353 : vector<8x32xf32>
      %384 = arith.mulf %368, %376 : vector<8x32xf32>
      %385 = arith.addf %383, %384 : vector<8x32xf32>
      %386 = math.tanh %385 : vector<8x32xf32>
      %387 = arith.mulf %382, %386 : vector<8x32xf32>
      %c2_101 = arith.constant 2 : index
      %c0_102 = arith.constant 0 : index
      %c0_103 = arith.constant 0 : index
      %388 = vector.load %arg8[%c2_101, %c0_102, %c0_103] : memref<5x8x32xf32, #tpu.memory_space<vmem>>, vector<1x8x32xf32>
      %389 = vector.shape_cast %388 : vector<1x8x32xf32> to vector<8x32xf32>
      %390 = vector.shape_cast %387 : vector<8x32xf32> to vector<1x8x32xf32>
      tpu.vector_store %arg8[%c2_101, %c0_102, %c0_103], %390 {strides = array<i32>} : memref<5x8x32xf32, #tpu.memory_space<vmem>>, vector<1x8x32xf32>,
      %391 = arith.truncf %387 : vector<8x32xf32> to vector<8x32xbf16>
      %cst_104 = arith.constant dense<0.000000e+00> : vector<8x128xf32>
      %392 = tpu.matmul %391, %293, %cst_104 {dimension_numbers = #tpu.dot_dimension_numbers<[1], [0], [0], [1], [0, 0, 1, 1], [], []>} : vector<8x32xbf16>, vector<32x128xbf16>, vector<8x128xf32> -> vector<8x128xf32>
      %393 = vector.broadcast %294 : vector<1x128xf32> to vector<8x128xf32>
      %394 = arith.addf %392, %393 : vector<8x128xf32>
      %395 = vector.extract_strided_slice %394 {offsets = [0, 0], sizes = [8, 32], strides = [1, 1]} : vector<8x128xf32> to vector<8x32xf32>
      %396 = arith.negf %395 : vector<8x32xf32>
      %397 = math.exp %396 : vector<8x32xf32>
      %cst_105 = arith.constant 1.000000e+00 : f32
      %398 = vector.broadcast %cst_105 : f32 to vector<8x32xf32>
      %399 = arith.addf %398, %397 : vector<8x32xf32>
      %400 = arith.divf %398, %399 : vector<8x32xf32>
      %401 = vector.extract_strided_slice %394 {offsets = [0, 32], sizes = [8, 32], strides = [1, 1]} : vector<8x128xf32> to vector<8x32xf32>
      %402 = arith.negf %401 : vector<8x32xf32>
      %403 = math.exp %402 : vector<8x32xf32>
      %cst_106 = arith.constant 1.000000e+00 : f32
      %404 = vector.broadcast %cst_106 : f32 to vector<8x32xf32>
      %405 = arith.addf %404, %403 : vector<8x32xf32>
      %406 = arith.divf %404, %405 : vector<8x32xf32>
      %407 = vector.extract_strided_slice %394 {offsets = [0, 64], sizes = [8, 32], strides = [1, 1]} : vector<8x128xf32> to vector<8x32xf32>
      %408 = math.tanh %407 : vector<8x32xf32>
      %409 = vector.extract_strided_slice %394 {offsets = [0, 96], sizes = [8, 32], strides = [1, 1]} : vector<8x128xf32> to vector<8x32xf32>
      %410 = arith.negf %409 : vector<8x32xf32>
      %411 = math.exp %410 : vector<8x32xf32>
      %cst_107 = arith.constant 1.000000e+00 : f32
      %412 = vector.broadcast %cst_107 : f32 to vector<8x32xf32>
      %413 = arith.addf %412, %411 : vector<8x32xf32>
      %414 = arith.divf %412, %413 : vector<8x32xf32>
      %415 = arith.mulf %406, %385 : vector<8x32xf32>
      %416 = arith.mulf %400, %408 : vector<8x32xf32>
      %417 = arith.addf %415, %416 : vector<8x32xf32>
      %418 = math.tanh %417 : vector<8x32xf32>
      %419 = arith.mulf %414, %418 : vector<8x32xf32>
      %c3_108 = arith.constant 3 : index
      %c0_109 = arith.constant 0 : index
      %c0_110 = arith.constant 0 : index
      %420 = vector.load %arg8[%c3_108, %c0_109, %c0_110] : memref<5x8x32xf32, #tpu.memory_space<vmem>>, vector<1x8x32xf32>
      %421 = vector.shape_cast %420 : vector<1x8x32xf32> to vector<8x32xf32>
      %422 = vector.shape_cast %419 : vector<8x32xf32> to vector<1x8x32xf32>
      tpu.vector_store %arg8[%c3_108, %c0_109, %c0_110], %422 {strides = array<i32>} : memref<5x8x32xf32, #tpu.memory_space<vmem>>, vector<1x8x32xf32>,
      %423 = arith.truncf %419 : vector<8x32xf32> to vector<8x32xbf16>
      %cst_111 = arith.constant dense<0.000000e+00> : vector<8x128xf32>
      %424 = tpu.matmul %423, %293, %cst_111 {dimension_numbers = #tpu.dot_dimension_numbers<[1], [0], [0], [1], [0, 0, 1, 1], [], []>} : vector<8x32xbf16>, vector<32x128xbf16>, vector<8x128xf32> -> vector<8x128xf32>
      %425 = vector.broadcast %294 : vector<1x128xf32> to vector<8x128xf32>
      %426 = arith.addf %424, %425 : vector<8x128xf32>
      %427 = vector.extract_strided_slice %426 {offsets = [0, 0], sizes = [8, 32], strides = [1, 1]} : vector<8x128xf32> to vector<8x32xf32>
      %428 = arith.negf %427 : vector<8x32xf32>
      %429 = math.exp %428 : vector<8x32xf32>
      %cst_112 = arith.constant 1.000000e+00 : f32
      %430 = vector.broadcast %cst_112 : f32 to vector<8x32xf32>
      %431 = arith.addf %430, %429 : vector<8x32xf32>
      %432 = arith.divf %430, %431 : vector<8x32xf32>
      %433 = vector.extract_strided_slice %426 {offsets = [0, 32], sizes = [8, 32], strides = [1, 1]} : vector<8x128xf32> to vector<8x32xf32>
      %434 = arith.negf %433 : vector<8x32xf32>
      %435 = math.exp %434 : vector<8x32xf32>
      %cst_113 = arith.constant 1.000000e+00 : f32
      %436 = vector.broadcast %cst_113 : f32 to vector<8x32xf32>
      %437 = arith.addf %436, %435 : vector<8x32xf32>
      %438 = arith.divf %436, %437 : vector<8x32xf32>
      %439 = vector.extract_strided_slice %426 {offsets = [0, 64], sizes = [8, 32], strides = [1, 1]} : vector<8x128xf32> to vector<8x32xf32>
      %440 = math.tanh %439 : vector<8x32xf32>
      %441 = vector.extract_strided_slice %426 {offsets = [0, 96], sizes = [8, 32], strides = [1, 1]} : vector<8x128xf32> to vector<8x32xf32>
      %442 = arith.negf %441 : vector<8x32xf32>
      %443 = math.exp %442 : vector<8x32xf32>
      %cst_114 = arith.constant 1.000000e+00 : f32
      %444 = vector.broadcast %cst_114 : f32 to vector<8x32xf32>
      %445 = arith.addf %444, %443 : vector<8x32xf32>
      %446 = arith.divf %444, %445 : vector<8x32xf32>
      %447 = arith.mulf %438, %417 : vector<8x32xf32>
      %448 = arith.mulf %432, %440 : vector<8x32xf32>
      %449 = arith.addf %447, %448 : vector<8x32xf32>
      %450 = math.tanh %449 : vector<8x32xf32>
      %451 = arith.mulf %446, %450 : vector<8x32xf32>
      %c4_115 = arith.constant 4 : index
      %c0_116 = arith.constant 0 : index
      %c0_117 = arith.constant 0 : index
      %452 = vector.load %arg8[%c4_115, %c0_116, %c0_117] : memref<5x8x32xf32, #tpu.memory_space<vmem>>, vector<1x8x32xf32>
      %453 = vector.shape_cast %452 : vector<1x8x32xf32> to vector<8x32xf32>
      %454 = vector.shape_cast %451 : vector<8x32xf32> to vector<1x8x32xf32>
      tpu.vector_store %arg8[%c4_115, %c0_116, %c0_117], %454 {strides = array<i32>} : memref<5x8x32xf32, #tpu.memory_space<vmem>>, vector<1x8x32xf32>,
    } else {
    }
    return
  }
  func.func @transform_0(%arg0: i32, %arg1: i32) -> (i32, i32, i32) {
    %c0_i32 = arith.constant 0 : i32
    %c0_i32_0 = arith.constant 0 : i32
    return %arg1, %arg0, %c0_i32 : i32, i32, i32
  }
  func.func @transform_1(%arg0: i32, %arg1: i32) -> (i32, i32) {
    %c0_i32 = arith.constant 0 : i32
    %c0_i32_0 = arith.constant 0 : i32
    %c0_i32_1 = arith.constant 0 : i32
    return %c0_i32, %c0_i32_0 : i32, i32
  }
  func.func @transform_2(%arg0: i32, %arg1: i32) -> (i32, i32) {
    %c0_i32 = arith.constant 0 : i32
    %c0_i32_0 = arith.constant 0 : i32
    %c0_i32_1 = arith.constant 0 : i32
    return %c0_i32, %c0_i32_0 : i32, i32
  }
  func.func @transform_3(%arg0: i32, %arg1: i32) -> (i32, i32) {
    %c0_i32 = arith.constant 0 : i32
    %c0_i32_0 = arith.constant 0 : i32
    %c0_i32_1 = arith.constant 0 : i32
    return %c0_i32, %c0_i32_0 : i32, i32
  }
  func.func @transform_4(%arg0: i32, %arg1: i32) -> (i32, i32) {
    %c0_i32 = arith.constant 0 : i32
    %c0_i32_0 = arith.constant 0 : i32
    %c0_i32_1 = arith.constant 0 : i32
    return %c0_i32, %c0_i32_0 : i32, i32
  }
  func.func @transform_5(%arg0: i32, %arg1: i32) -> (i32, i32) {
    %c0_i32 = arith.constant 0 : i32
    %c0_i32_0 = arith.constant 0 : i32
    %c0_i32_1 = arith.constant 0 : i32
    return %c0_i32, %c0_i32_0 : i32, i32
  }
  func.func @transform_6(%arg0: i32, %arg1: i32) -> (i32, i32, i32) {
    %c0_i32 = arith.constant 0 : i32
    %c0_i32_0 = arith.constant 0 : i32
    %c0_i32_1 = arith.constant 0 : i32
    return %c0_i32, %arg0, %c0_i32_0 : i32, i32, i32
  }
}

</mosaic_0001>

<bundles_post_ra>
// kernel: tpu_custom_call.1
= control target key start
LH: loop header
LB: loop body
LE: loop exit
PB: predicated region body
PF: predicated region fallthrough
CT: control target
= control target key end

     0   :  { %11 = vsyncpa [#allocation6], 0  ;;  %s2886_s0 = inlined_call_operand.hbm [shape: bf16[16,8,32], index: 0, kind: input, shape index: {}]   ;;  %s2887_s1 = inlined_call_operand.hbm [shape: bf16[32,128], index: 1, kind: input, shape index: {}]   ;;  %s2888_s2 = inlined_call_operand.hbm [shape: bf16[32,128], index: 2, kind: input, shape index: {}]   ;;  %s2889_s3 = inlined_call_operand.vmem [shape: f32[1,128], index: 3, kind: input, shape index: {}]   ;;  %s2890_s4 = inlined_call_operand.hbm [shape: bf16[32,128], index: 4, kind: input, shape index: {}]   ;;  %s2891_s5 = inlined_call_operand.vmem [shape: f32[1,128], index: 5, kind: input, shape index: {}]   ;;  %s2892_s6 = inlined_call_operand.hbm [shape: f32[5,8,32], index: 6, kind: output, shape index: {}]  }
   0x1   :  { %13 = vsyncpa [#allocation6 + $0x1], 0 }
   0x2   :  { %14 = vsyncpa [#allocation9], 0 }
   0x3   :  { %15 = vsyncpa [#allocation12], 0 }
   0x4   :  { %16 = vsyncpa [#allocation7], 0  ;;  %s2366_s21 = smov 0   ;;  %s2368_s22 = smov 0  }
   0x5   :  { %s2370_s23 = smov 0   ;;  %s2372_s24 = smov 0  }
   0x6   :  { %s2374_s25 = smov 0   ;;  %s2376_s26 = smov 0  }
   0x7 LB: > { %s2895_s27 = sadd.s32 4294967295, %s2310_s26   ;;  %p56_p0 = scmp.ne.s32.totalorder %s2294_s22, %s2290_s21  ;;  %s2310_s26 = sphi %s2376_s26, %s22_s26   ;;  %s2306_s25 = sphi %s2374_s25, %s2916_s25   ;;  %s2302_s24 = sphi %s2372_s24, %s2915_s24   ;;  %s2298_s23 = sphi %s2370_s23, %s2914_s23   ;;  %s2294_s22 = sphi %s2368_s22, %s2913_s22   ;;  %s2290_s21 = sphi %s2366_s21, %s2912_s21  }
   0x8   : > { %p2398_p1 = scmp.eq.s32.totalorder %s2895_s27, 0  ;;  %p1663_p2 = scmp.ge.s32.totalorder %s2310_s26, 1 }
   0x9   : > { %p198_p3 = scmp.lt.s32.totalorder %s2310_s26, 3  ;;  %s2312_s7 = smov [#allocation8]  }
   0xa   : > { %s2898_s28 = scalar_select %p2398_p1, 1, 0 }
   0xb   : > { %p2406_p4 = por %p2398_p1, %p56_p0  ;;  %p2410_p5 = pnand %p1663_p2, %p198_p3 }
   0xc   : > { %s210_s8 = sshll.u32 %s2312_s7, 4  ;;  %s2313_s10 = smov [#allocation10]   ;;  %s2414_s8 = int_to_ptr.vmem [resolvable:$true] %s210_s8 }
   0xd   : > { %s2899_s29 = scalar_select %p2406_p4, 1, 0 }
   0xe   : > { %s2900_s30 = scalar_select %p2410_p5, 1, 0 }
   0xf   : > { %p1905_p6 = pneg %p2410_p5  ;;  %s223_s11 = sshll.u32 %s2313_s10, 4  ;;  %s2424_s11 = int_to_ptr.vmem [resolvable:$true] %s223_s11 }
  0x10   : > { %s2314_s12 = smov [#allocation11]   ;;  %s2108_s16 = scalar_lea.hbm %s2887_s1, 256 }
  0x11   : > { %p2420_p7 = pnand %p1905_p6, %p2398_p1  ;;  %s2426_s13 = sshll.u32 %s2314_s12, 4  ;;  %s240_s13 = int_to_ptr.vmem [resolvable:$true] %s2426_s13 }
  0x12   : > { %p2109_p8 = scmp.ne.s32.totalorder %s2887_s1, %s2108_s16  ;;  %p2115_p12 = scmp.lt.u32.totalorder %s2108_s16, %s2887_s1 }
  0x13   : > { %p2436_p9 = pneg %p2420_p7 }
  0x15   : > { %p2111_p10 = pnand %p2436_p9, %p2109_p8 }
  0x17   : > { %p2112_p11 = pneg %p2111_p10 }
  0x19   : > { %p2117_p13 = pnand %p2115_p12, %p2112_p11 }
  0x1b   : > { %2120 = shalt.err (!%p2117_p13)
}
  0x1c   : > { %s2121_s7 = scalar_lea.vmem %s2414_s8, 256  ;;  %p2129_p6 = scmp.lt.s32.totalorder %s2414_s8, %s2414_s8 }
  0x1d   : > { %p2122_p0 = scmp.ne.s32.totalorder %s2414_s8, %s2121_s7  ;;  %p2130_p1 = scmp.lt.s32.totalorder %s2121_s7, %s2121_s7 }
  0x1f   : > { %p2124_p2 = pnand %p2122_p0, %p2436_p9  ;;  %p2131_p8 = por %p2130_p1, %p2129_p6 }
  0x21   : > { %p2125_p3 = pneg %p2124_p2 }
  0x23   : > { %p2132_p10 = pnand %p2131_p8, %p2125_p3 }
  0x25   : > { %2135 = shalt.err (!%p2132_p10)
}
  0x26   : > { %s2315_s10 = smov 64   ;;  %s2316_s12 = smov 4  }
  0x27   : > { %1908 = dma.hbm_to_vmem [thread:$0]  (!%p2420_p7), %s2887_s1, 256, %s2414_s8, [#allocation9], %s2315_s10, %s2315_s10, %s2316_s12  }
  0x28   : > { %s2136_s18 = scalar_lea.hbm %s2888_s2, 256 }
  0x29   : > { %p2137_p1 = scmp.ne.s32.totalorder %s2888_s2, %s2136_s18  ;;  %p2143_p13 = scmp.lt.u32.totalorder %s2136_s18, %s2888_s2 }
  0x2b   : > { %p2139_p11 = pnand %p2137_p1, %p2436_p9 }
  0x2d   : > { %p2140_p12 = pneg %p2139_p11 }
  0x2f   : > { %p2145_p0 = pnand %p2143_p13, %p2140_p12 }
  0x31   : > { %2148 = shalt.err (!%p2145_p0)
}
  0x32   : > { %s2149_s8 = scalar_lea.vmem %s2424_s11, 256  ;;  %p2157_p8 = scmp.lt.s32.totalorder %s2424_s11, %s2424_s11 }
  0x33   : > { %p2150_p2 = scmp.ne.s32.totalorder %s2424_s11, %s2149_s8  ;;  %p2158_p10 = scmp.lt.s32.totalorder %s2149_s8, %s2149_s8 }
  0x35   : > { %p2152_p3 = pnand %p2150_p2, %p2436_p9  ;;  %p2159_p1 = por %p2158_p10, %p2157_p8 }
  0x37   : > { %p2153_p6 = pneg %p2152_p3 }
  0x39   : > { %p2160_p11 = pnand %p2159_p1, %p2153_p6 }
  0x3b   : > { %2163 = shalt.err (!%p2160_p11)
}
  0x3c   : > { %1911 = dma.hbm_to_vmem [thread:$0]  (!%p2420_p7), %s2888_s2, 256, %s2424_s11, [#allocation9], %s2315_s10, %s2315_s10, %s2316_s12  }
  0x3d   : > { %s2164_s17 = scalar_lea.hbm %s2890_s4, 256 }
  0x3e   : > { %p2165_p12 = scmp.ne.s32.totalorder %s2890_s4, %s2164_s17  ;;  %p2171_p2 = scmp.lt.u32.totalorder %s2164_s17, %s2890_s4 }
  0x40   : > { %p2167_p13 = pnand %p2165_p12, %p2436_p9 }
  0x42   : > { %p2168_p0 = pneg %p2167_p13 }
  0x44   : > { %p2173_p3 = pnand %p2171_p2, %p2168_p0 }
  0x46   : > { %2176 = shalt.err (!%p2173_p3)
}
  0x47   : > { %s2177_s8 = scalar_lea.vmem %s240_s13, 256  ;;  %p2185_p1 = scmp.lt.s32.totalorder %s240_s13, %s240_s13 }
  0x48   : > { %p2178_p6 = scmp.ne.s32.totalorder %s240_s13, %s2177_s8  ;;  %p2186_p11 = scmp.lt.s32.totalorder %s2177_s8, %s2177_s8 }
  0x4a   : > { %p2180_p8 = pnand %p2178_p6, %p2436_p9  ;;  %p2187_p4 = por %p2186_p11, %p2185_p1 }
  0x4c   : > { %p2181_p10 = pneg %p2180_p8 }
  0x4e   : > { %p2188_p5 = pnand %p2187_p4, %p2181_p10 }
  0x50   : > { %2191 = shalt.err (!%p2188_p5)
}
  0x51   : > { %1914 = dma.hbm_to_vmem [thread:$0]  (!%p2420_p7), %s2890_s4, 256, %s240_s13, [#allocation12], %s2315_s10, %s2315_s10, %s2316_s12  }
  0x52   : > { %s31_s19 = sadd.s32 1, %s2306_s25  ;;  %p50_p4 = scmp.ne.s32.totalorder %s2298_s23, %s2294_s22 }
  0x53   : > { %p32_p5 = scmp.ge.s32.totalorder %s31_s19, 2  ;;  %p51_p9 = scmp.eq.s32.totalorder %s2310_s26, 0 }
  0x54   : > { %s43_s9 = sadd.s32 1, %s2298_s23  ;;  %s256_s14 = sand.u32 1, %s2298_s23  }
  0x55   : > { %s2918_s19 = smov (%p32_p5, %s31_s19), 0  ;;  %p52_p12 = por %p51_p9, %p50_p4 }
  0x56   : > { %p1922_p13 = scmp.lt.s32.totalorder %s2310_s26, 2  ;;  %s38_s15 = ssub.s32 %s2306_s25, %s2918_s19 }
  0x57   : > { %s1668_s16 = sshll.u32 %s256_s14, 5  ;;  %p41_p0 = scmp.eq.s32.totalorder %s38_s15, 0 }
  0x58   : > { %s1725_s17 = sshll.u32 %s2306_s25, 9  ;;  %s260_s18 = scalar_lea.vmem [#allocation5], %s1668_s16 }
  0x59   : > { %s268_s20 = sshll.u32 %s260_s18, 4  ;;  %s2526_s8 = scalar_lea.hbm %s2886_s0, %s1725_s17  ;;  %s2528_s20 = int_to_ptr.vmem [resolvable:$true] %s268_s20 }
  0x5a   : > { %s2521_s21 = scalar_select %p41_p0, %s2298_s23, %s43_s9  }
  0x5b   : > { %p2530_p7 = pnand %p1922_p13, %p52_p12  ;;  %s2534_s27 = scalar_lea.sflag [#allocation6], %s256_s14 }
  0x5c   : > { %s2192_s9 = scalar_lea.hbm %s2526_s8, 512  ;;  %s2197_s17 = scalar_lea.hbm %s2886_s0, 1024 }
  0x5d   : > { %p2193_p2 = scmp.ne.s32.totalorder %s2526_s8, %s2192_s9  ;;  %p2194_p3 = pneg %p2530_p7 }
  0x5e   : > { %p2198_p10 = scmp.lt.u32.totalorder %s2526_s8, %s2886_s0  ;;  %p2199_p1 = scmp.lt.u32.totalorder %s2197_s17, %s2192_s9 }
  0x5f   : > { %p2195_p6 = pnand %p2194_p3, %p2193_p2  ;;  %p2201_p4 = scmp.lt.u32.totalorder %s2192_s9, %s2526_s8 }
  0x60   : > { %p2200_p11 = por %p2199_p1, %p2198_p10 }
  0x61   : > { %p2196_p8 = pneg %p2195_p6 }
  0x62   : > { %p2202_p5 = por %p2201_p4, %p2200_p11 }
  0x64   : > { %p2203_p9 = pnand %p2202_p5, %p2196_p8 }
  0x66   : > { %2206 = shalt.err (!%p2203_p9)
}
  0x67   : > { %s2207_s14 = scalar_lea.vmem %s2528_s20, 512  ;;  %s2317_s7 = smov [#allocation5]  }
  0x68   : > { %p2208_p12 = scmp.ne.s32.totalorder %s2528_s20, %s2207_s14  ;;  %s2212_s15 = sshll.u32 %s2317_s7, 4  ;;  %s2213_s15 = int_to_ptr.vmem [resolvable:$false] %s2212_s15 }
  0x69   : > { %s2214_s16 = scalar_lea.vmem %s2213_s15, 1024  ;;  %p2215_p2 = scmp.lt.s32.totalorder %s2528_s20, %s2213_s15 }
  0x6a   : > { %p2210_p13 = pnand %p2208_p12, %p2194_p3  ;;  %p2216_p6 = scmp.lt.s32.totalorder %s2214_s16, %s2207_s14 }
  0x6c   : > { %p2211_p0 = pneg %p2210_p13  ;;  %p2217_p10 = por %p2216_p6, %p2215_p2 }
  0x6e   : > { %p2218_p1 = pnand %p2217_p10, %p2211_p0 }
  0x70   : > { %2221 = shalt.err (!%p2218_p1)
}
  0x71   : > { %1918 = dma.hbm_to_vmem [thread:$0]  (!%p2530_p7), %s2526_s8, 512, %s2528_s20, %s2534_s27, %s2315_s10, %s2315_s10, %s2316_s12  }
  0x72   : > { %p2904_p3 = scmp.ne.s32.totalorder %s2900_s30, 0 }
  0x73   : > { %s282_s9 = sand.u32 (!%p2904_p3), 1, %s2294_s22   ;;  %p2905_p8 = scmp.ne.s32.totalorder (!%p2904_p3), %s2899_s29, 0 }
  0x74   : > { %280 = sbr.rel (%p2904_p3) target bundleno = 9335 (0x2477), region = 44  ;;  %s1672_s17 = sshll.u32 (!%p2904_p3), %s282_s9, 5 }
  0x75   : > { %s283_s18 = scalar_lea.sflag (!%p2904_p3), [#allocation6], %s282_s9  ;;  %s2568_s13 = scalar_lea.vmem (!%p2904_p3), [#allocation5], %s1672_s17 }
  0x7b   : > { %2273 = dma.done.wait (%p2905_p8), %s283_s18, 512  }
  0x7c   : > { %2275 = vsyncadd (%p2905_p8), %s283_s18, 4294966784  ;;  %p2906_p11 = scmp.ne.s32.totalorder %s2898_s28, 0 }
  0x7e   : > { %2277 = dma.done.wait (%p2906_p11), [#allocation9], 512  }
  0x7f   : > { %2279 = vsyncadd (%p2906_p11), [#allocation9], 4294966784 }
  0x80   : > { %2281 = dma.done.wait (%p2906_p11), [#allocation12], 256  }
  0x81   : > { %2283 = vsyncadd (%p2906_p11), [#allocation12], 4294967040  ;;  %p1676_p7 = scmp.ne.s32.totalorder %s2302_s24, 0 }
  0x82   : > { %vm328_vm0 = vcmask (!%p1676_p7), 261120   ;;  %v2318_v0 = vmov (!%p1676_p7), 0.0  }
  0x83   : > { %327 = sbr.rel (%p1676_p7) target bundleno = 138 (0x8a), region = 64  ;;  %329 = vst.msk [vmem:[#allocation2] sm:$0xff] (!%p1676_p7), %vm328_vm0, %v2318_v0  ;;  %330 = vst.msk [vmem:[#allocation3] sm:$0xff] (!%p1676_p7), %vm328_vm0, %v2318_v0 }
  0x8a PF: > { %v1994_v1 = vld [vmem:[#allocation8] sm:$0xff]   ;;  %v2319_v2 = vmov 0.0   ;;  %v2584_v3 = vld [vmem:[#allocation10] sm:$0xff]   ;;  %v1996_v4 = vld [vmem:[#allocation8 + $0x8] sm:$0xff]   ;;  %vm382_vm1 = vcmask 261120   ;;  %vm2320_vm2 = vmmov 0  }
  0x8b   : > { %1783 = vmatprep.subr.bf16.mxu1 %v2319_v2  ;;  %1771 = vmatprep.subr.bf16.mxu0 %v1994_v1  ;;  %v2587_v5 = vld [vmem:[#allocation10 + $0x8] sm:$0xff]   ;;  %v1998_v6 = vld [vmem:[%s2568_s13] sm:$0xff]   ;;  %v1999_v7 = vld [vmem:[%s2568_s13 + $0x8] sm:$0xff]   ;;  %s2321_s30 = smov 64   ;;  %s2322_s10 = smov 32  }
  0x8c   : > { %1772 = vmatpush3.bf16.msra.mxu0 %v1994_v1  ;;  %1784 = vmatpush3.bf16.msra.mxu1 %v2584_v3  ;;  %v473_v8 = vld [vmem:[#allocation2] sm:$0xff]  ;;  %v474_v22 = vld [vmem:[#allocation3] sm:$0xff]  ;;  %s2323_s12 = smov 96   ;;  %s2626_s20 = sshll.u32 %s2302_s24, 3 }
  0x8d   : > { %1773 = vmatprep.subr.bf16.mxu0 %v1996_v4  ;;  %1785 = vmatprep.subr.bf16.mxu1 %v2319_v2  ;;  %v476_v9 = vpack.c.bf16 %v473_v8, %v473_v8  ;;  %v2613_v10 = vld [vmem:[%s2889_s3] ss:$0 sm:$0xff]  ;;  %p561_p4 = scmp.lt.s32.totalorder %s2626_s20, 14  ;;  %v2001_v60 = vld [vmem:[%s2568_s13 + $0x18] sm:$0xff]   ;;  %s645_s11 = sadd.s32 1, %s2626_s20 }
  0x8e   : > { %1787 = vmatprep.mubr.msk.bf16.mxu1 %vm2320_vm2, %v2319_v2  ;;  %1775 = vmatprep.mubr.msk.bf16.mxu0 %vm382_vm1, %v1998_v6  ;;  %v2000_v59 = vld [vmem:[%s2568_s13 + $0x10] sm:$0xff]   ;;  %p646_p5 = scmp.lt.s32.totalorder %s645_s11, 14  ;;  %s726_s14 = sadd.s32 2, %s2626_s20 }
  0x8f   : > { %s562_s8 = scalar_select %p561_p4, 1, 0 }
  0x90   : > { %1774 = vmatpush3.bf16.msra.mxu0 %v1996_v4  ;;  %1786 = vmatpush3.bf16.msra.mxu1 %v2587_v5  ;;  %s647_s27 = scalar_select %p646_p5, 1, 0 }
  0x91   : > { %1791 = vmatprep.subr.bf16.mxu1 %v2319_v2  ;;  %1799 = vmatprep.subr.bf16.mxu0 %v2319_v2  ;;  %v563_v34 = vstv %s562_s8  ;;  %p727_p9 = scmp.lt.s32.totalorder %s726_s14, 14  ;;  %s807_s15 = sadd.s32 3, %s2626_s20 }
  0x92   : > { %vm2629_vm3 = vcmp.eq.s32.totalorder %v563_v34, 1  ;;  %v648_v62 = vstv %s647_s27  ;;  %p808_p12 = scmp.lt.s32.totalorder %s807_s15, 14  ;;  %s888_s9 = sadd.s32 4, %s2626_s20 }
  0x93   : > { %1776 = vmatmul.mubr.msk.bf16.vlgmr.msra.gmra.mrb[0].mxu0 %vm382_vm1, %v1999_v7  ;;  %1788 = vmatmul.mubr.msk.bf16.vlgmr.msra.gmra.mrb[0].mxu1 %vm382_vm1, %v476_v9  ;;  %vm649_vm4 = vcmp.eq.s32.totalorder %v648_v62, 1  ;;  %s728_s7 = scalar_select %p727_p9, 1, 0 }
  0x94   : > { %1792 = vmatpush3.bf16.msra.mxu1 %v2584_v3  ;;  %1795 = vmatprep.mubr.msk.bf16.mxu1 %vm2320_vm2, %v2319_v2  ;;  %s809_s16 = scalar_select %p808_p12, 1, 0 }
  0x95   : > { %1793 = vmatprep.subr.bf16.mxu1 %v2319_v2  ;;  %1800 = vmatpush3.bf16.msra.mxu0 %v2584_v3  ;;  %p889_p13 = scmp.lt.s32.totalorder %s888_s9, 14  ;;  %s969_s18 = sadd.s32 5, %s2626_s20 }
  0x96   : > { %1801 = vmatprep.subr.bf16.mxu0 %v2319_v2  ;;  %1779 = vmatprep.mubr.msk.bf16.mxu0 %vm382_vm1, %v2000_v59  ;;  %p970_p0 = scmp.lt.s32.totalorder %s969_s18, 14  ;;  %s1050_s28 = sadd.s32 6, %s2626_s20 }
  0x97   : > { %s890_s17 = scalar_select %p889_p13, 1, 0 }
  0x98   : > { %1794 = vmatpush3.bf16.msra.mxu1 %v2587_v5  ;;  %s971_s13 = scalar_select %p970_p0, 1, 0 }
  0x99   : > { %1802 = vmatpush3.bf16.msra.mxu0 %v2587_v5  ;;  %1807 = vmatprep.subr.bf16.mxu1 %v2319_v2  ;;  %p1051_p2 = scmp.lt.s32.totalorder %s1050_s28, 14  ;;  %s1131_s8 = sadd.s32 7, %s2626_s20 }
  0x9a   : > { %1815 = vmatprep.subr.bf16.mxu0 %v2319_v2  ;;  %p1132_p6 = scmp.lt.s32.totalorder %s1131_s8, 14  ;;  %p1707_p10 = scmp.ne.s32.totalorder %s2302_s24, 1 }
  0x9b   : > { %1780 = vmatmul.mubr.msk.bf16.gmra.mrb[4].mxu0 %vm382_vm1, %v2001_v60  ;;  %s1052_s29 = scalar_select %p1051_p2, 1, 0 }
  0x9c   : > { %1803 = vmatprep.mubr.msk.bf16.mxu0 %vm2320_vm2, %v2319_v2  ;;  %s1133_s11 = scalar_select %p1132_p6, 1, 0 }
  0x9d   : > { %vm2326_vm11 = vmmov (!%p1707_p10), 0  }
 0x166   : > { %v2615_v11 = vpop.f32.mrb[0].mxu0  ;;  %v526_v12 = vpop.f32.mrb[0].mxu1 }
 0x167   : > { %v429_v13 = vpop.f32.mrb[1].mxu0  ;;  %v1789_v14 = vpop.f32.mrb[1].mxu1 }
 0x168   : > { %v430_v15 = vadd.f32 %v2613_v10, %v429_v13  ;;  %v2618_v16 = vpop.f32.mrb[2].mxu0  ;;  %v529_v17 = vpop.f32.mrb[2].mxu1  ;;  %v438_v13 = vadd.f32 %v2615_v11, %v2613_v10 }
 0x169   : > { %v432_v18 = vpop.f32.mrb[3].mxu0  ;;  %v1790_v19 = vpop.f32.mrb[3].mxu1 }
 0x16a   : > { %v532_v20 = vadd.f32 %v526_v12, %v430_v15  ;;  %v433_v42 = vadd.f32 %v2613_v10, %v432_v18 }
 0x16c   : > { %2002 = vtanh.f32 %v532_v20  ;;  %v1692_v23 = vmul.f32 -1.442695, %v532_v20 }
 0x16e   : > { %2004 = vpow2.f32 %v1692_v23  ;;  %v2658_v6 = vpop.f32.mrb[4].mxu0 }
 0x16f   : > { %v2660_v7 = vpop.f32.mrb[5].mxu0 }
 0x170   : > { %v446_v60 = vadd.f32 %v2613_v10, %v2660_v7 }
 0x176   : > { %v2003_v21 = vpop.eup %2002 }
 0x177   : > { %546 = vrot.lane.b32.xlu0 %v2003_v21, %s2321_s30 }
 0x178   : > { %v2005_v24 = vpop.eup %2004 }
 0x179   : > { %v536_v25 = vadd.f32 1.0, %v2005_v24 }
 0x17b   : > { %541 = vrot.lane.b32.xlu0 %v474_v22, %s2322_s10  ;;  %2006 = vrcp.f32 %v536_v25 }
 0x17f   : > { %566 = vrot.lane.b32.xlu0 %v473_v8, %s2323_s12  ;;  %v2662_v8 = vpop.f32.mrb[6].mxu0 }
 0x180   : > { %v2664_v9 = vpop.f32.mrb[7].mxu0 }
 0x185   : > { %v2007_v26 = vpop.eup %2006 }
 0x1e9   : > { %v547_v27 = vpop.permute.xlu0 %546 }
 0x1ea   : > { %v549_v28 = vmul.f32 %v2007_v26, %v547_v27 }
 0x1ec   : > { %551 = vrot.lane.b32.xlu1 %v549_v28, %s2322_s10 }
 0x1ed   : > { %v542_v29 = vpop.permute.xlu0 %541 }
 0x1ee   : > { %v544_v30 = vmul.f32 %v2007_v26, %v542_v29 }
 0x1f1   : > { %v567_v36 = vpop.permute.xlu0 %566 }
 0x25e   : > { %v552_v31 = vpop.permute.xlu1 %551 }
 0x25f   : > { %v554_v32 = vadd.f32 %v552_v31, %v544_v30  ;;  %v729_v31 = vstv %s728_s7 }
 0x260   : > { %vm730_vm5 = vcmp.eq.s32.totalorder %v729_v31, 1 }
 0x261   : > { %2008 = vtanh.f32 %v554_v32  ;;  %v570_v55 = vsel %vm2629_vm3, %v554_v32, %v542_v29 }
 0x26b   : > { %v2009_v33 = vpop.eup %2008 }
 0x26c   : > { %557 = vrot.lane.b32.xlu1 %v2009_v33, %s2321_s30 }
 0x2de   : > { %v558_v35 = vpop.permute.xlu1 %557 }
 0x2df   : > { %v560_v37 = vmul.f32 %v2007_v26, %v558_v35 }
 0x2e1   : > { %v569_v39 = vsel %vm2629_vm3, %v560_v37, %v567_v36  ;;  %v441_v37 = vadd.f32 %v2618_v16, %v2613_v10 }
 0x2e2   : > { %v573_v40 = vpack.c.bf16 %v569_v39, %v569_v39 }
 0x2e4   : > { %575 = vrot.lane.b32.xlu1 %v573_v40, %s2322_s10 }
 0x356   : > { %v576_v41 = vpop.permute.xlu1 %575 }
 0x357   : > { %1796 = vmatmul.mubr.msk.bf16.vlgmr.msra.gmra.mrb[4].mxu1 %vm382_vm1, %v576_v41 }
 0x358   : > { %1808 = vmatpush3.bf16.msra.mxu1 %v2584_v3  ;;  %1811 = vmatprep.mubr.msk.bf16.mxu1 %vm2320_vm2, %v2319_v2 }
 0x359   : > { %1809 = vmatprep.subr.bf16.mxu1 %v2319_v2 }
 0x35c   : > { %1810 = vmatpush3.bf16.msra.mxu1 %v2587_v5 }
 0x35d   : > { %1823 = vmatprep.subr.bf16.mxu1 %v2319_v2 }
 0x42a   : > { %v614_v43 = vpop.f32.mrb[4].mxu1 }
 0x42b   : > { %v620_v44 = vadd.f32 %v614_v43, %v433_v42  ;;  %v1797_v45 = vpop.f32.mrb[5].mxu1 }
 0x42c   : > { %v617_v46 = vpop.f32.mrb[6].mxu1 }
 0x42d   : > { %2010 = vtanh.f32 %v620_v44  ;;  %v1798_v47 = vpop.f32.mrb[7].mxu1  ;;  %v1694_v49 = vmul.f32 -1.442695, %v620_v44 }
 0x42f   : > { %2012 = vpow2.f32 %v1694_v49 }
 0x437   : > { %v2011_v48 = vpop.eup %2010 }
 0x438   : > { %630 = vrot.lane.b32.xlu0 %v2011_v48, %s2321_s30 }
 0x439   : > { %v2013_v50 = vpop.eup %2012 }
 0x43a   : > { %v624_v51 = vadd.f32 1.0, %v2013_v50 }
 0x43c   : > { %2014 = vrcp.f32 %v624_v51 }
 0x446   : > { %v2015_v52 = vpop.eup %2014 }
 0x447   : > { %v628_v56 = vmul.f32 %v2015_v52, %v570_v55 }
 0x4aa   : > { %v631_v53 = vpop.permute.xlu0 %630 }
 0x4ab   : > { %v633_v54 = vmul.f32 %v2015_v52, %v631_v53 }
 0x4ad   : > { %635 = vrot.lane.b32.xlu1 %v633_v54, %s2322_s10  ;;  %v810_v54 = vstv %s809_s16 }
 0x4ae   : > { %vm811_vm6 = vcmp.eq.s32.totalorder %v810_v54, 1 }
 0x51f   : > { %v636_v57 = vpop.permute.xlu1 %635 }
 0x520   : > { %v638_v58 = vadd.f32 %v636_v57, %v628_v56 }
 0x522   : > { %2016 = vtanh.f32 %v638_v58  ;;  %v651_v11 = vsel %vm649_vm4, %v638_v58, %v570_v55 }
 0x52c   : > { %v2017_v61 = vpop.eup %2016 }
 0x52d   : > { %641 = vrot.lane.b32.xlu0 %v2017_v61, %s2321_s30 }
 0x59f   : > { %v642_v63 = vpop.permute.xlu0 %641 }
 0x5a0   : > { %v644_v0 = vmul.f32 %v2015_v52, %v642_v63 }
 0x5a2   : > { %v650_v1 = vsel %vm649_vm4, %v644_v0, %v569_v39 }
 0x5a3   : > { %v654_v4 = vpack.c.bf16 %v650_v1, %v650_v1 }
 0x5a5   : > { %656 = vrot.lane.b32.xlu1 %v654_v4, %s2322_s10 }
 0x617   : > { %v657_v12 = vpop.permute.xlu1 %656 }
 0x618   : > { %1804 = vmatmul.mubr.msk.bf16.vlgmr.msra.gmra.mrb[8].mxu0 %vm382_vm1, %v657_v12 }
 0x619   : > { %1816 = vmatpush3.bf16.msra.mxu0 %v2584_v3  ;;  %1819 = vmatprep.mubr.msk.bf16.mxu0 %vm2320_vm2, %v2319_v2 }
 0x61a   : > { %1817 = vmatprep.subr.bf16.mxu0 %v2319_v2 }
 0x61d   : > { %1818 = vmatpush3.bf16.msra.mxu0 %v2587_v5 }
 0x61e   : > { %1831 = vmatprep.subr.bf16.mxu0 %v2319_v2 }
 0x6eb   : > { %v695_v14 = vpop.f32.mrb[8].mxu0 }
 0x6ec   : > { %v701_v15 = vadd.f32 %v695_v14, %v438_v13  ;;  %v1805_v17 = vpop.f32.mrb[9].mxu0 }
 0x6ed   : > { %v698_v18 = vpop.f32.mrb[10].mxu0 }
 0x6ee   : > { %2018 = vtanh.f32 %v701_v15  ;;  %v1806_v19 = vpop.f32.mrb[11].mxu0  ;;  %v1696_v21 = vmul.f32 -1.442695, %v701_v15 }
 0x6f0   : > { %2020 = vpow2.f32 %v1696_v21 }
 0x6f8   : > { %v2019_v20 = vpop.eup %2018 }
 0x6f9   : > { %711 = vrot.lane.b32.xlu0 %v2019_v20, %s2321_s30 }
 0x6fa   : > { %v2021_v22 = vpop.eup %2020 }
 0x6fb   : > { %v705_v23 = vadd.f32 1.0, %v2021_v22 }
 0x6fd   : > { %2022 = vrcp.f32 %v705_v23  ;;  %v891_v23 = vstv %s890_s17 }
 0x6fe   : > { %vm892_vm7 = vcmp.eq.s32.totalorder %v891_v23, 1 }
 0x707   : > { %v2023_v24 = vpop.eup %2022 }
 0x708   : > { %v709_v27 = vmul.f32 %v2023_v24, %v651_v11 }
 0x76b   : > { %v712_v25 = vpop.permute.xlu0 %711 }
 0x76c   : > { %v714_v26 = vmul.f32 %v2023_v24, %v712_v25 }
 0x76e   : > { %716 = vrot.lane.b32.xlu1 %v714_v26, %s2322_s10 }
 0x7e0   : > { %v717_v28 = vpop.permute.xlu1 %716 }
 0x7e1   : > { %v719_v29 = vadd.f32 %v717_v28, %v709_v27  ;;  %v449_v28 = vadd.f32 %v2613_v10, %v2664_v9 }
 0x7e3   : > { %2024 = vtanh.f32 %v719_v29  ;;  %v732_v16 = vsel %vm730_vm5, %v719_v29, %v651_v11 }
 0x7ed   : > { %v2025_v30 = vpop.eup %2024 }
 0x7ee   : > { %722 = vrot.lane.b32.xlu0 %v2025_v30, %s2321_s30 }
 0x860   : > { %v723_v32 = vpop.permute.xlu0 %722 }
 0x861   : > { %v725_v33 = vmul.f32 %v2023_v24, %v723_v32 }
 0x863   : > { %v731_v34 = vsel %vm730_vm5, %v725_v33, %v650_v1 }
 0x864   : > { %v735_v35 = vpack.c.bf16 %v731_v34, %v731_v34 }
 0x866   : > { %737 = vrot.lane.b32.xlu1 %v735_v35, %s2322_s10 }
 0x8d8   : > { %v738_v36 = vpop.permute.xlu1 %737 }
 0x8d9   : > { %1812 = vmatmul.mubr.msk.bf16.vlgmr.msra.gmra.mrb[8].mxu1 %vm382_vm1, %v738_v36 }
 0x8da   : > { %1824 = vmatpush3.bf16.msra.mxu1 %v2584_v3  ;;  %1827 = vmatprep.mubr.msk.bf16.mxu1 %vm2320_vm2, %v2319_v2 }
 0x8db   : > { %1825 = vmatprep.subr.bf16.mxu1 %v2319_v2 }
 0x8de   : > { %1826 = vmatpush3.bf16.msra.mxu1 %v2587_v5 }
 0x8df   : > { %1839 = vmatprep.subr.bf16.mxu1 %v2319_v2 }
 0x9ac   : > { %v776_v38 = vpop.f32.mrb[8].mxu1 }
 0x9ad   : > { %v782_v39 = vadd.f32 %v776_v38, %v441_v37  ;;  %v1813_v40 = vpop.f32.mrb[9].mxu1 }
 0x9ae   : > { %v779_v41 = vpop.f32.mrb[10].mxu1 }
 0x9af   : > { %2026 = vtanh.f32 %v782_v39  ;;  %v1814_v42 = vpop.f32.mrb[11].mxu1  ;;  %v1698_v44 = vmul.f32 -1.442695, %v782_v39 }
 0x9b0   : > { %v972_v42 = vstv %s971_s13 }
 0x9b1   : > { %2028 = vpow2.f32 %v1698_v44  ;;  %vm973_vm8 = vcmp.eq.s32.totalorder %v972_v42, 1 }
 0x9b9   : > { %v2027_v43 = vpop.eup %2026 }
 0x9ba   : > { %792 = vrot.lane.b32.xlu0 %v2027_v43, %s2321_s30 }
 0x9bb   : > { %v2029_v45 = vpop.eup %2028 }
 0x9bc   : > { %v786_v46 = vadd.f32 1.0, %v2029_v45 }
 0x9be   : > { %2030 = vrcp.f32 %v786_v46 }
 0x9c8   : > { %v2031_v47 = vpop.eup %2030 }
 0x9c9   : > { %v790_v50 = vmul.f32 %v2031_v47, %v732_v16 }
 0xa2c   : > { %v793_v48 = vpop.permute.xlu0 %792 }
 0xa2d   : > { %v795_v49 = vmul.f32 %v2031_v47, %v793_v48  ;;  %v454_v48 = vadd.f32 %v2658_v6, %v2613_v10 }
 0xa2f   : > { %797 = vrot.lane.b32.xlu1 %v795_v49, %s2322_s10 }
 0xaa1   : > { %v798_v51 = vpop.permute.xlu1 %797 }
 0xaa2   : > { %v800_v52 = vadd.f32 %v798_v51, %v790_v50 }
 0xaa4   : > { %2032 = vtanh.f32 %v800_v52  ;;  %v813_v7 = vsel %vm811_vm6, %v800_v52, %v732_v16 }
 0xaae   : > { %v2033_v53 = vpop.eup %2032 }
 0xaaf   : > { %803 = vrot.lane.b32.xlu0 %v2033_v53, %s2321_s30 }
 0xb21   : > { %v804_v55 = vpop.permute.xlu0 %803 }
 0xb22   : > { %v806_v56 = vmul.f32 %v2031_v47, %v804_v55 }
 0xb24   : > { %v812_v57 = vsel %vm811_vm6, %v806_v56, %v731_v34 }
 0xb25   : > { %v816_v58 = vpack.c.bf16 %v812_v57, %v812_v57 }
 0xb27   : > { %818 = vrot.lane.b32.xlu1 %v816_v58, %s2322_s10 }
 0xb99   : > { %v819_v59 = vpop.permute.xlu1 %818 }
 0xb9a   : > { %1820 = vmatmul.mubr.msk.bf16.vlgmr.msra.gmra.mrb[12].mxu0 %vm382_vm1, %v819_v59 }
 0xb9b   : > { %1832 = vmatpush3.bf16.msra.mxu0 %v2584_v3  ;;  %1835 = vmatprep.mubr.msk.bf16.mxu0 %vm2320_vm2, %v2319_v2 }
 0xb9c   : > { %1833 = vmatprep.subr.bf16.mxu0 %v2319_v2 }
 0xb9f   : > { %1834 = vmatpush3.bf16.msra.mxu0 %v2587_v5 }
 0xc6d   : > { %v857_v61 = vpop.f32.mrb[12].mxu0 }
 0xc6e   : > { %v863_v62 = vadd.f32 %v857_v61, %v446_v60  ;;  %v1821_v63 = vpop.f32.mrb[13].mxu0 }
 0xc6f   : > { %v860_v0 = vpop.f32.mrb[14].mxu0 }
 0xc70   : > { %2034 = vtanh.f32 %v863_v62  ;;  %v1822_v1 = vpop.f32.mrb[15].mxu0  ;;  %v1700_v12 = vmul.f32 -1.442695, %v863_v62  ;;  %v1053_v0 = vstv %s1052_s29 }
 0xc71   : > { %vm1054_vm9 = vcmp.eq.s32.totalorder %v1053_v0, 1 }
 0xc72   : > { %2036 = vpow2.f32 %v1700_v12 }
 0xc7a   : > { %v2035_v4 = vpop.eup %2034 }
 0xc7b   : > { %873 = vrot.lane.b32.xlu0 %v2035_v4, %s2321_s30 }
 0xc7c   : > { %v2037_v13 = vpop.eup %2036 }
 0xc7d   : > { %v867_v14 = vadd.f32 1.0, %v2037_v13 }
 0xc7f   : > { %2038 = vrcp.f32 %v867_v14 }
 0xc89   : > { %v2039_v15 = vpop.eup %2038 }
 0xc8a   : > { %v871_v19 = vmul.f32 %v2039_v15, %v813_v7 }
 0xced   : > { %v874_v17 = vpop.permute.xlu0 %873 }
 0xcee   : > { %v876_v18 = vmul.f32 %v2039_v15, %v874_v17 }
 0xcf0   : > { %878 = vrot.lane.b32.xlu1 %v876_v18, %s2322_s10 }
 0xd62   : > { %v879_v20 = vpop.permute.xlu1 %878 }
 0xd63   : > { %v881_v21 = vadd.f32 %v879_v20, %v871_v19 }
 0xd65   : > { %2040 = vtanh.f32 %v881_v21  ;;  %v894_v9 = vsel %vm892_vm7, %v881_v21, %v813_v7 }
 0xd6f   : > { %v2041_v22 = vpop.eup %2040 }
 0xd70   : > { %884 = vrot.lane.b32.xlu0 %v2041_v22, %s2321_s30 }
 0xde2   : > { %v885_v24 = vpop.permute.xlu0 %884 }
 0xde3   : > { %v887_v25 = vmul.f32 %v2039_v15, %v885_v24  ;;  %v457_v15 = vadd.f32 %v2662_v8, %v2613_v10 }
 0xde5   : > { %v893_v26 = vsel %vm892_vm7, %v887_v25, %v812_v57 }
 0xde6   : > { %v897_v11 = vpack.c.bf16 %v893_v26, %v893_v26 }
 0xde8   : > { %899 = vrot.lane.b32.xlu1 %v897_v11, %s2322_s10 }
 0xe5a   : > { %v900_v27 = vpop.permute.xlu1 %899 }
 0xe5b   : > { %1828 = vmatmul.mubr.msk.bf16.vlgmr.msra.gmra.mrb[12].mxu1 %vm382_vm1, %v900_v27 }
 0xe5c   : > { %1840 = vmatpush3.bf16.msra.mxu1 %v2584_v3  ;;  %1843 = vmatprep.mubr.msk.bf16.mxu1 %vm2320_vm2, %v2319_v2 }
 0xe5d   : > { %1841 = vmatprep.subr.bf16.mxu1 %v2319_v2 }
 0xe60   : > { %1842 = vmatpush3.bf16.msra.mxu1 %v2587_v5 }
 0xf2e   : > { %v938_v29 = vpop.f32.mrb[12].mxu1 }
 0xf2f   : > { %v944_v30 = vadd.f32 %v938_v29, %v449_v28  ;;  %v1829_v31 = vpop.f32.mrb[13].mxu1  ;;  %v1134_v29 = vstv %s1133_s11 }
 0xf30   : > { %v941_v32 = vpop.f32.mrb[14].mxu1  ;;  %vm1135_vm10 = vcmp.eq.s32.totalorder %v1134_v29, 1 }
 0xf31   : > { %2042 = vtanh.f32 %v944_v30  ;;  %v1830_v33 = vpop.f32.mrb[15].mxu1  ;;  %v1702_v3 = vmul.f32 -1.442695, %v944_v30 }
 0xf33   : > { %2044 = vpow2.f32 %v1702_v3 }
 0xf3b   : > { %v2043_v34 = vpop.eup %2042 }
 0xf3c   : > { %954 = vrot.lane.b32.xlu0 %v2043_v34, %s2321_s30 }
 0xf3d   : > { %v2045_v35 = vpop.eup %2044 }
 0xf3e   : > { %v948_v36 = vadd.f32 1.0, %v2045_v35 }
 0xf40   : > { %2046 = vrcp.f32 %v948_v36 }
 0xf4a   : > { %v2047_v2 = vpop.eup %2046 }
 0xf4b   : > { %v952_v38 = vmul.f32 %v2047_v2, %v894_v9 }
 0xfae   : > { %v955_v5 = vpop.permute.xlu0 %954 }
 0xfaf   : > { %v957_v37 = vmul.f32 %v2047_v2, %v955_v5  ;;  %v2752_v5 = vld [vmem:[#allocation11] sm:$0xff] (!%p1707_p10)  }
 0xfb1   : > { %959 = vrot.lane.b32.xlu1 %v957_v37, %s2322_s10  ;;  %v2759_v37 = vld [vmem:[#allocation11 + $0x8] sm:$0xff] (!%p1707_p10)  }
0x1023   : > { %v960_v39 = vpop.permute.xlu1 %959 }
0x1024   : > { %v962_v40 = vadd.f32 %v960_v39, %v952_v38  ;;  %v2780_v38 = vld [vmem:[%s2891_s5] ss:$0 sm:$0xff] (!%p1707_p10) }
0x1026   : > { %2048 = vtanh.f32 %v962_v40  ;;  %v975_v6 = vsel %vm973_vm8, %v962_v40, %v894_v9 }
0x1030   : > { %v2049_v41 = vpop.eup %2048 }
0x1031   : > { %965 = vrot.lane.b32.xlu0 %v2049_v41, %s2321_s30 }
0x10a3   : > { %v966_v43 = vpop.permute.xlu0 %965 }
0x10a4   : > { %v968_v44 = vmul.f32 %v2047_v2, %v966_v43  ;;  %v2324_v2 = vmov (!%p1707_p10), 0.0  }
0x10a5   : > { %1847 = vmatprep.subr.bf16.mxu0 (!%p1707_p10), %v2324_v2  ;;  %1855 = vmatprep.subr.bf16.mxu1 (!%p1707_p10), %v2324_v2 }
0x10a6   : > { %v974_v45 = vsel %vm973_vm8, %v968_v44, %v893_v26 }
0x10a7   : > { %v978_v46 = vpack.c.bf16 %v974_v45, %v974_v45 }
0x10a9   : > { %980 = vrot.lane.b32.xlu1 %v978_v46, %s2322_s10 }
0x111b   : > { %v981_v47 = vpop.permute.xlu1 %980 }
0x111c   : > { %1836 = vmatmul.mubr.msk.bf16.vlgmr.msra.gmra.mrb[16].mxu0 %vm382_vm1, %v981_v47 }
0x111d   : > { %1851 = vmatprep.mubr.msk.bf16.mxu0 (!%p1707_p10), %vm2326_vm11, %v2324_v2  ;;  %1848 = vmatpush3.bf16.msra.mxu0 (!%p1707_p10), %v2752_v5 }
0x111e   : > { %1849 = vmatprep.subr.bf16.mxu0 (!%p1707_p10), %v2324_v2 }
0x1121   : > { %1850 = vmatpush3.bf16.msra.mxu0 (!%p1707_p10), %v2759_v37 }
0x1122   : > { %1863 = vmatprep.subr.bf16.mxu0 (!%p1707_p10), %v2324_v2 }
0x11ef   : > { %v1019_v49 = vpop.f32.mrb[16].mxu0 }
0x11f0   : > { %v1025_v16 = vadd.f32 %v1019_v49, %v454_v48  ;;  %v1837_v50 = vpop.f32.mrb[17].mxu0 }
0x11f1   : > { %v1022_v51 = vpop.f32.mrb[18].mxu0 }
0x11f2   : > { %2050 = vtanh.f32 %v1025_v16  ;;  %v1838_v52 = vpop.f32.mrb[19].mxu0  ;;  %v1704_v54 = vmul.f32 -1.442695, %v1025_v16 }
0x11f4   : > { %2052 = vpow2.f32 %v1704_v54 }
0x11fc   : > { %v2051_v53 = vpop.eup %2050 }
0x11fd   : > { %1035 = vrot.lane.b32.xlu0 %v2051_v53, %s2321_s30 }
0x11fe   : > { %v2053_v55 = vpop.eup %2052 }
0x11ff   : > { %v1029_v56 = vadd.f32 1.0, %v2053_v55 }
0x1201   : > { %2054 = vrcp.f32 %v1029_v56 }
0x120b   : > { %v2055_v57 = vpop.eup %2054 }
0x120c   : > { %v1033_v60 = vmul.f32 %v2055_v57, %v975_v6 }
0x126f   : > { %v1036_v58 = vpop.permute.xlu0 %1035 }
0x1270   : > { %v1038_v59 = vmul.f32 %v2055_v57, %v1036_v58 }
0x1272   : > { %1040 = vrot.lane.b32.xlu1 %v1038_v59, %s2322_s10 }
0x12e4   : > { %v1041_v61 = vpop.permute.xlu1 %1040 }
0x12e5   : > { %v1043_v62 = vadd.f32 %v1041_v61, %v1033_v60 }
0x12e7   : > { %2056 = vtanh.f32 %v1043_v62  ;;  %v1056_v10 = vsel %vm1054_vm9, %v1043_v62, %v975_v6 }
0x12f1   : > { %v2057_v63 = vpop.eup %2056 }
0x12f2   : > { %1046 = vrot.lane.b32.xlu0 %v2057_v63, %s2321_s30 }
0x1364   : > { %v1047_v1 = vpop.permute.xlu0 %1046 }
0x1365   : > { %v1049_v4 = vmul.f32 %v2055_v57, %v1047_v1 }
0x1367   : > { %v1055_v12 = vsel %vm1054_vm9, %v1049_v4, %v974_v45 }
0x1368   : > { %v1059_v13 = vpack.c.bf16 %v1055_v12, %v1055_v12 }
0x136a   : > { %1061 = vrot.lane.b32.xlu1 %v1059_v13, %s2322_s10 }
0x13dc   : > { %v1062_v14 = vpop.permute.xlu1 %1061 }
0x13dd   : > { %1844 = vmatmul.mubr.msk.bf16.vlgmr.msra.gmra.mrb[16].mxu1 %vm382_vm1, %v1062_v14 }
0x13de   : > { %1856 = vmatpush3.bf16.msra.mxu1 (!%p1707_p10), %v2752_v5  ;;  %1859 = vmatprep.mubr.msk.bf16.mxu1 (!%p1707_p10), %vm2326_vm11, %v2324_v2 }
0x13df   : > { %1857 = vmatprep.subr.bf16.mxu1 (!%p1707_p10), %v2324_v2 }
0x13e2   : > { %1858 = vmatpush3.bf16.msra.mxu1 (!%p1707_p10), %v2759_v37 }
0x13e3   : > { %1871 = vmatprep.subr.bf16.mxu1 (!%p1707_p10), %v2324_v2 }
0x14b0   : > { %v1100_v17 = vpop.f32.mrb[16].mxu1 }
0x14b1   : > { %v1106_v18 = vadd.f32 %v1100_v17, %v457_v15  ;;  %v1845_v7 = vpop.f32.mrb[17].mxu1 }
0x14b2   : > { %v1103_v19 = vpop.f32.mrb[18].mxu1 }
0x14b3   : > { %2058 = vtanh.f32 %v1106_v18  ;;  %v1846_v20 = vpop.f32.mrb[19].mxu1  ;;  %v1706_v22 = vmul.f32 -1.442695, %v1106_v18 }
0x14b5   : > { %2060 = vpow2.f32 %v1706_v22 }
0x14bd   : > { %v2059_v21 = vpop.eup %2058 }
0x14be   : > { %1116 = vrot.lane.b32.xlu0 %v2059_v21, %s2321_s30 }
0x14bf   : > { %v2061_v23 = vpop.eup %2060 }
0x14c0   : > { %v1110_v24 = vadd.f32 1.0, %v2061_v23 }
0x14c2   : > { %2062 = vrcp.f32 %v1110_v24 }
0x14cc   : > { %v2063_v25 = vpop.eup %2062 }
0x14cd   : > { %v1114_v8 = vmul.f32 %v2063_v25, %v1056_v10 }
0x1530   : > { %v1117_v26 = vpop.permute.xlu0 %1116 }
0x1531   : > { %v1119_v11 = vmul.f32 %v2063_v25, %v1117_v26 }
0x1533   : > { %1121 = vrot.lane.b32.xlu1 %v1119_v11, %s2322_s10 }
0x15a5   : > { %v1122_v27 = vpop.permute.xlu1 %1121 }
0x15a6   : > { %v1124_v28 = vadd.f32 %v1122_v27, %v1114_v8 }
0x15a8   : > { %2064 = vtanh.f32 %v1124_v28  ;;  %v1137_v31 = vsel %vm1135_vm10, %v1124_v28, %v1056_v10 }
0x15b2   : > { %v2065_v30 = vpop.eup %2064 }
0x15b3   : > { %1127 = vrot.lane.b32.xlu0 %v2065_v30, %s2321_s30  ;;  %s2325_s30 = smov (!%p1707_p10), 32  }
0x15b7   : > { %1144 = vrot.lane.b32.xlu0 %v1137_v31, %s2323_s12  ;;  %s2327_s12 = smov (!%p1707_p10), 64  }
0x1625   : > { %v1128_v32 = vpop.permute.xlu0 %1127 }
0x1626   : > { %v1130_v33 = vmul.f32 %v2063_v25, %v1128_v32 }
0x1628   : > { %v1136_v34 = vsel %vm1135_vm10, %v1130_v33, %v1055_v12 }
0x1629   : > { %1139 = vrot.lane.b32.xlu1 %v1136_v34, %s2322_s10  ;;  %v1145_v3 = vpop.permute.xlu0 %1144  ;;  %v1157_v36 = vpack.c.bf16 (!%p1707_p10), %v1136_v34, %v1136_v34 }
0x162a   : > { %1147 = vst.msk [vmem:[#allocation3] sm:$0xff] %vm382_vm1, %v1145_v3 }
0x162b   : > { %1165 = vrot.lane.b32.xlu0 (!%p1707_p10), %v1157_v36, %s2325_s30 }
0x1696   : > { %1151 = sbr.rel (%p1707_p10) target bundleno = 9309 (0x245d), region = 68 }
0x169b   : > { %v1140_v35 = vpop.permute.xlu1 %1139 }
0x169c   : > { %1142 = vst.msk [vmem:[#allocation2] sm:$0xff] %vm382_vm1, %v1140_v35 }
0x169d   : > { %v1166_v9 = vpop.permute.xlu0 %1165 }
0x169e   : > { %1852 = vmatmul.mubr.msk.bf16.vlgmr.msra.gmra.mrb[0].mxu0 %vm382_vm1, %v1166_v9 }
0x169f   : > { %1864 = vmatpush3.bf16.msra.mxu0 %v2752_v5  ;;  %1867 = vmatprep.mubr.msk.bf16.mxu0 %vm2326_vm11, %v2324_v2 }
0x16a0   : > { %1865 = vmatprep.subr.bf16.mxu0 %v2324_v2 }
0x16a3   : > { %1866 = vmatpush3.bf16.msra.mxu0 %v2759_v37 }
0x16a4   : > { %1879 = vmatprep.subr.bf16.mxu0 %v2324_v2 }
0x1771   : > { %v1216_v39 = vpop.f32.mrb[0].mxu0 }
0x1772   : > { %v1217_v40 = vadd.f32 %v2780_v38, %v1216_v39  ;;  %v1853_v41 = vpop.f32.mrb[1].mxu0 }
0x1773   : > { %v1219_v42 = vpop.f32.mrb[2].mxu0 }
0x1774   : > { %2068 = vtanh.f32 %v1217_v40  ;;  %v1854_v43 = vpop.f32.mrb[3].mxu0  ;;  %v1712_v45 = vmul.f32 -1.442695, %v1217_v40 }
0x1776   : > { %2070 = vpow2.f32 %v1712_v45 }
0x177e   : > { %v2069_v44 = vpop.eup %2068 }
0x177f   : > { %1231 = vrot.lane.b32.xlu0 %v2069_v44, %s2327_s12 }
0x1780   : > { %v2071_v46 = vpop.eup %2070 }
0x1781   : > { %v1225_v47 = vadd.f32 1.0, %v2071_v46 }
0x1783   : > { %2072 = vrcp.f32 %v1225_v47 }
0x178d   : > { %v2073_v48 = vpop.eup %2072 }
0x178e   : > { %v1229_v50 = vmul.f32 %v2073_v48, %v1137_v31 }
0x17f1   : > { %v1232_v49 = vpop.permute.xlu0 %1231 }
0x17f2   : > { %v1234_v16 = vmul.f32 %v2073_v48, %v1232_v49 }
0x17f4   : > { %1236 = vrot.lane.b32.xlu1 %v1234_v16, %s2325_s30 }
0x1866   : > { %v1237_v51 = vpop.permute.xlu1 %1236 }
0x1867   : > { %v1239_v52 = vadd.f32 %v1237_v51, %v1229_v50 }
0x1869   : > { %2074 = vtanh.f32 %v1239_v52 }
0x1873   : > { %v2075_v53 = vpop.eup %2074 }
0x1874   : > { %1242 = vrot.lane.b32.xlu1 %v2075_v53, %s2327_s12 }
0x18e6   : > { %v1243_v54 = vpop.permute.xlu1 %1242 }
0x18e7   : > { %v2786_v55 = vmul.f32 %v2073_v48, %v1243_v54 }
0x18e9   : > { %v1251_v56 = vpack.c.bf16 %v2786_v55, %v2786_v55 }
0x18eb   : > { %1253 = vrot.lane.b32.xlu0 %v1251_v56, %s2325_s30 }
0x195d   : > { %v1254_v57 = vpop.permute.xlu0 %1253 }
0x195e   : > { %1860 = vmatmul.mubr.msk.bf16.vlgmr.msra.gmra.mrb[0].mxu1 %vm382_vm1, %v1254_v57 }
0x195f   : > { %1872 = vmatpush3.bf16.msra.mxu1 %v2752_v5  ;;  %1875 = vmatprep.mubr.msk.bf16.mxu1 %vm2326_vm11, %v2324_v2 }
0x1960   : > { %1873 = vmatprep.subr.bf16.mxu1 %v2324_v2 }
0x1963   : > { %1874 = vmatpush3.bf16.msra.mxu1 %v2759_v37 }
0x1a31   : > { %v1292_v58 = vpop.f32.mrb[0].mxu1 }
0x1a32   : > { %v1293_v59 = vadd.f32 %v2780_v38, %v1292_v58  ;;  %v1861_v6 = vpop.f32.mrb[1].mxu1 }
0x1a33   : > { %v1295_v60 = vpop.f32.mrb[2].mxu1 }
0x1a34   : > { %2076 = vtanh.f32 %v1293_v59  ;;  %v1862_v61 = vpop.f32.mrb[3].mxu1  ;;  %v1714_v63 = vmul.f32 -1.442695, %v1293_v59 }
0x1a36   : > { %2078 = vpow2.f32 %v1714_v63 }
0x1a3e   : > { %v2077_v62 = vpop.eup %2076 }
0x1a3f   : > { %1307 = vrot.lane.b32.xlu1 %v2077_v62, %s2327_s12 }
0x1a40   : > { %v2079_v0 = vpop.eup %2078 }
0x1a41   : > { %v1301_v1 = vadd.f32 1.0, %v2079_v0 }
0x1a43   : > { %2080 = vrcp.f32 %v1301_v1 }
0x1a4d   : > { %v2081_v4 = vpop.eup %2080 }
0x1a4e   : > { %v1305_v14 = vmul.f32 %v2081_v4, %v1239_v52 }
0x1ab1   : > { %v1308_v12 = vpop.permute.xlu1 %1307 }
0x1ab2   : > { %v1310_v13 = vmul.f32 %v2081_v4, %v1308_v12 }
0x1ab4   : > { %1312 = vrot.lane.b32.xlu0 %v1310_v13, %s2325_s30 }
0x1b26   : > { %v1313_v15 = vpop.permute.xlu0 %1312 }
0x1b27   : > { %v1315_v17 = vadd.f32 %v1313_v15, %v1305_v14 }
0x1b29   : > { %2082 = vtanh.f32 %v1315_v17 }
0x1b33   : > { %v2083_v18 = vpop.eup %2082 }
0x1b34   : > { %1318 = vrot.lane.b32.xlu1 %v2083_v18, %s2327_s12 }
0x1ba6   : > { %v1319_v7 = vpop.permute.xlu1 %1318 }
0x1ba7   : > { %v2801_v19 = vmul.f32 %v2081_v4, %v1319_v7 }
0x1ba9   : > { %v1328_v20 = vpack.c.bf16 %v2801_v19, %v2801_v19 }
0x1bab   : > { %1330 = vrot.lane.b32.xlu0 %v1328_v20, %s2325_s30 }
0x1c1d   : > { %v1331_v21 = vpop.permute.xlu0 %1330 }
0x1c1e   : > { %1868 = vmatmul.mubr.msk.bf16.vlgmr.msra.gmra.mrb[4].mxu0 %vm382_vm1, %v1331_v21 }
0x1c1f   : > { %1880 = vmatpush3.bf16.msra.mxu0 %v2752_v5  ;;  %1883 = vmatprep.mubr.msk.bf16.mxu0 %vm2326_vm11, %v2324_v2 }
0x1c20   : > { %1881 = vmatprep.subr.bf16.mxu0 %v2324_v2 }
0x1c23   : > { %1882 = vmatpush3.bf16.msra.mxu0 %v2759_v37 }
0x1cf1   : > { %v1369_v22 = vpop.f32.mrb[4].mxu0 }
0x1cf2   : > { %v1370_v23 = vadd.f32 %v2780_v38, %v1369_v22  ;;  %v1869_v24 = vpop.f32.mrb[5].mxu0 }
0x1cf3   : > { %v1372_v25 = vpop.f32.mrb[6].mxu0 }
0x1cf4   : > { %2084 = vtanh.f32 %v1370_v23  ;;  %v1870_v26 = vpop.f32.mrb[7].mxu0  ;;  %v1716_v10 = vmul.f32 -1.442695, %v1370_v23 }
0x1cf6   : > { %2086 = vpow2.f32 %v1716_v10 }
0x1cfe   : > { %v2085_v11 = vpop.eup %2084 }
0x1cff   : > { %1384 = vrot.lane.b32.xlu1 %v2085_v11, %s2327_s12 }
0x1d00   : > { %v2087_v8 = vpop.eup %2086 }
0x1d01   : > { %v1378_v27 = vadd.f32 1.0, %v2087_v8 }
0x1d03   : > { %2088 = vrcp.f32 %v1378_v27 }
0x1d0d   : > { %v2089_v28 = vpop.eup %2088 }
0x1d0e   : > { %v1382_v31 = vmul.f32 %v2089_v28, %v1315_v17 }
0x1d71   : > { %v1385_v29 = vpop.permute.xlu1 %1384 }
0x1d72   : > { %v1387_v30 = vmul.f32 %v2089_v28, %v1385_v29 }
0x1d74   : > { %1389 = vrot.lane.b32.xlu0 %v1387_v30, %s2325_s30 }
0x1de6   : > { %v1390_v32 = vpop.permute.xlu0 %1389 }
0x1de7   : > { %v1392_v33 = vadd.f32 %v1390_v32, %v1382_v31 }
0x1de9   : > { %2090 = vtanh.f32 %v1392_v33 }
0x1df3   : > { %v2091_v34 = vpop.eup %2090 }
0x1df4   : > { %1395 = vrot.lane.b32.xlu1 %v2091_v34, %s2327_s12 }
0x1e66   : > { %v1396_v3 = vpop.permute.xlu1 %1395 }
0x1e67   : > { %v1398_v35 = vmul.f32 %v2089_v28, %v1396_v3 }
0x1e69   : > { %v1405_v36 = vpack.c.bf16 %v1398_v35, %v1398_v35 }
0x1e6b   : > { %1407 = vrot.lane.b32.xlu0 %v1405_v36, %s2325_s30 }
0x1edd   : > { %v1408_v2 = vpop.permute.xlu0 %1407 }
0x1ede   : > { %1876 = vmatmul.mubr.msk.bf16.vlgmr.msra.gmra.mrb[4].mxu1 %vm382_vm1, %v1408_v2 }
0x1fb1   : > { %v1446_v5 = vpop.f32.mrb[4].mxu1 }
0x1fb2   : > { %v1447_v37 = vadd.f32 %v2780_v38, %v1446_v5  ;;  %v1877_v9 = vpop.f32.mrb[5].mxu1 }
0x1fb3   : > { %v1449_v39 = vpop.f32.mrb[6].mxu1 }
0x1fb4   : > { %2092 = vtanh.f32 %v1447_v37  ;;  %v1878_v40 = vpop.f32.mrb[7].mxu1  ;;  %v1718_v42 = vmul.f32 -1.442695, %v1447_v37 }
0x1fb6   : > { %2094 = vpow2.f32 %v1718_v42 }
0x1fbe   : > { %v2093_v41 = vpop.eup %2092 }
0x1fbf   : > { %1461 = vrot.lane.b32.xlu1 %v2093_v41, %s2327_s12 }
0x1fc0   : > { %v2095_v43 = vpop.eup %2094 }
0x1fc1   : > { %v1455_v44 = vadd.f32 1.0, %v2095_v43 }
0x1fc3   : > { %2096 = vrcp.f32 %v1455_v44 }
0x1fcd   : > { %v2097_v45 = vpop.eup %2096 }
0x1fce   : > { %v1459_v48 = vmul.f32 %v2097_v45, %v1392_v33 }
0x2031   : > { %v1462_v46 = vpop.permute.xlu1 %1461 }
0x2032   : > { %v1464_v47 = vmul.f32 %v2097_v45, %v1462_v46 }
0x2034   : > { %1466 = vrot.lane.b32.xlu0 %v1464_v47, %s2325_s30 }
0x20a6   : > { %v1467_v49 = vpop.permute.xlu0 %1466 }
0x20a7   : > { %v1469_v16 = vadd.f32 %v1467_v49, %v1459_v48 }
0x20a9   : > { %2098 = vtanh.f32 %v1469_v16 }
0x20b3   : > { %v2099_v50 = vpop.eup %2098 }
0x20b4   : > { %1472 = vrot.lane.b32.xlu1 %v2099_v50, %s2327_s12 }
0x2126   : > { %v1473_v51 = vpop.permute.xlu1 %1472 }
0x2127   : > { %v1475_v52 = vmul.f32 %v2097_v45, %v1473_v51 }
0x2129   : > { %v1482_v53 = vpack.c.bf16 %v1475_v52, %v1475_v52 }
0x212b   : > { %1484 = vrot.lane.b32.xlu0 %v1482_v53, %s2325_s30 }
0x219d   : > { %v1485_v54 = vpop.permute.xlu0 %1484 }
0x219e   : > { %1884 = vmatmul.mubr.msk.bf16.vlgmr.msra.gmra.mrb[8].mxu0 %vm382_vm1, %v1485_v54 }
0x2271   : > { %v1523_v56 = vpop.f32.mrb[8].mxu0 }
0x2272   : > { %v1524_v57 = vadd.f32 %v2780_v38, %v1523_v56  ;;  %v1885_v58 = vpop.f32.mrb[9].mxu0 }
0x2273   : > { %v1526_v59 = vpop.f32.mrb[10].mxu0 }
0x2274   : > { %2100 = vtanh.f32 %v1524_v57  ;;  %v1886_v6 = vpop.f32.mrb[11].mxu0  ;;  %v1720_v61 = vmul.f32 -1.442695, %v1524_v57 }
0x2276   : > { %2102 = vpow2.f32 %v1720_v61 }
0x227e   : > { %v2101_v60 = vpop.eup %2100 }
0x227f   : > { %1538 = vrot.lane.b32.xlu1 %v2101_v60, %s2327_s12 }
0x2280   : > { %v2103_v62 = vpop.eup %2102 }
0x2281   : > { %v1532_v63 = vadd.f32 1.0, %v2103_v62 }
0x2283   : > { %2104 = vrcp.f32 %v1532_v63 }
0x228d   : > { %v2105_v0 = vpop.eup %2104 }
0x228e   : > { %v1536_v38 = vmul.f32 %v2105_v0, %v1469_v16 }
0x22f1   : > { %v1539_v1 = vpop.permute.xlu1 %1538 }
0x22f2   : > { %v1541_v4 = vmul.f32 %v2105_v0, %v1539_v1 }
0x22f4   : > { %1543 = vrot.lane.b32.xlu0 %v1541_v4, %s2325_s30 }
0x22f8   : > { %1247 = vrot.lane.b32.xlu0 %v2786_v55, %s2325_s30 }
0x22fc   : > { %1400 = vrot.lane.b32.xlu0 %v1398_v35, %s2325_s30 }
0x2366   : > { %v1544_v12 = vpop.permute.xlu0 %1543 }
0x2367   : > { %v1546_v13 = vadd.f32 %v1544_v12, %v1536_v38 }
0x2369   : > { %2106 = vtanh.f32 %v1546_v13 }
0x236a   : > { %v1248_v14 = vpop.permute.xlu0 %1247 }
0x236b   : > { %1250 = vst.msk [vmem:[#allocation13] sm:$0xff] %vm382_vm1, %v1248_v14 }
0x236e   : > { %v1401_v15 = vpop.permute.xlu0 %1400 }
0x236f   : > { %1404 = vst.msk [vmem:[#allocation13 + $0x10] sm:$0xff] %vm382_vm1, %v1401_v15 }
0x2373   : > { %v2107_v17 = vpop.eup %2106 }
0x2374   : > { %1549 = vrot.lane.b32.xlu1 %v2107_v17, %s2327_s12 }
0x2378   : > { %1323 = vrot.lane.b32.xlu1 %v2801_v19, %s2325_s30 }
0x237c   : > { %1477 = vrot.lane.b32.xlu1 %v1475_v52, %s2325_s30 }
0x23e6   : > { %v1550_v55 = vpop.permute.xlu1 %1549 }
0x23e7   : > { %v1552_v18 = vmul.f32 %v2105_v0, %v1550_v55 }
0x23e9   : > { %1554 = vrot.lane.b32.xlu0 %v1552_v18, %s2325_s30 }
0x23ea   : > { %v1324_v7 = vpop.permute.xlu1 %1323 }
0x23eb   : > { %1327 = vst.msk [vmem:[#allocation13 + $0x8] sm:$0xff] %vm382_vm1, %v1324_v7 }
0x23ee   : > { %v1478_v20 = vpop.permute.xlu1 %1477 }
0x23ef   : > { %1481 = vst.msk [vmem:[#allocation13 + $0x18] sm:$0xff] %vm382_vm1, %v1478_v20 }
0x245b   : > { %v1555_v21 = vpop.permute.xlu0 %1554 }
0x245c   : > { %1558 = vst.msk [vmem:[#allocation13 + $0x20] sm:$0xff] %vm382_vm1, %v1555_v21 }
0x245d PF: > { %s2909_s20 = sadd.s32 4294967295, %s2310_s26   ;;  %s2328_s14 = smov [#allocation13]  }
0x245e   : > { %p2842_p1 = scmp.eq.s32.totalorder %s2909_s20, 1  ;;  %s1567_s7 = sshll.u32 %s2328_s14, 4  ;;  %s1568_s7 = int_to_ptr.vmem [resolvable:$true] %s1567_s7 }
0x245f   : > { %s2222_s15 = scalar_lea.vmem %s1568_s7, 640  ;;  %p2229_p7 = scmp.lt.s32.totalorder %s1568_s7, %s1568_s7 }
0x2460   : > { %p2223_p3 = scmp.ne.s32.totalorder %s1568_s7, %s2222_s15  ;;  %p2230_p4 = scmp.lt.s32.totalorder %s2222_s15, %s2222_s15 }
0x2462   : > { %p2224_p8 = pnand %p2223_p3, %p2842_p1  ;;  %p2231_p5 = por %p2230_p4, %p2229_p7 }
0x2464   : > { %p2225_p11 = pneg %p2224_p8 }
0x2466   : > { %p2232_p9 = pnand %p2231_p5, %p2225_p11 }
0x2468   : > { %2235 = shalt.err (!%p2232_p9)
}
0x2469   : > { %s2236_s17 = scalar_lea.hbm %s2892_s6, 640 }
0x246a   : > { %p2237_p12 = scmp.ne.s32.totalorder %s2892_s6, %s2236_s17  ;;  %p2242_p2 = scmp.lt.u32.totalorder %s2236_s17, %s2892_s6 }
0x246c   : > { %p2238_p13 = pnand %p2237_p12, %p2842_p1 }
0x246e   : > { %p2239_p0 = pneg %p2238_p13 }
0x2470   : > { %p2244_p6 = pnand %p2242_p2, %p2239_p0 }
0x2472   : > { %2247 = shalt.err (!%p2244_p6)
}
0x2473   : > { %s2329_s8 = smov 128   ;;  %s2330_s11 = smov 8  }
0x2474   : > { %1902 = dma.vmem_to_hbm [thread:$0]  (%p2842_p1), %s1568_s7, 640, %s2892_s6, [#allocation7], %s2329_s8, %s2329_s8, %s2330_s11  }
0x2475   : > { %2285 = dma.done.wait (%p2842_p1), [#allocation7], 640  }
0x2476   : > { %2287 = vsyncadd (%p2842_p1), [#allocation7], 4294966656 }
0x2477 PF: > { %s22_s26 = sadd.s32 1, %s2310_s26   ;;  %s2911_s10 = smov %s2521_s21 }
0x2478   : > { %p19_p10 = scmp.ge.s32.totalorder %s22_s26, 4   ;;  %s2912_s21 = smov %s2294_s22 }
0x2479   : > { %s2913_s22 = smov %s2298_s23  ;;  %s2914_s23 = smov %s2911_s10 }
0x247a   : > { %s2915_s24 = smov %s2306_s25  ;;  %s2916_s25 = smov %s2918_s19 }
0x247b   :  { %21 = sbr.rel (!%p19_p10) target bundleno = 7 (0x7), region = 113 }
0x2482   :  { %1583 = vsyncpa [#allocation6], 1 }
0x2483   :  { %1585 = vsyncpa [#allocation6 + $0x1], 1 }
0x2484   :  { %1586 = vsyncpa [#allocation9], 1 }
0x2485   :  { %1587 = vsyncpa [#allocation12], 1 }
0x2486   :  { %1588 = vsyncpa [#allocation7], 1 }
0x2487   :  { %1590 = vsyncpa [#allocation7 + $0x1], 1 }

</bundles_post_ra>
